<compile_context>
chip_gen: v7x
topology: tpu7x:2x2x1
jax: 0.10.0
libtpu: 0.0.40
codegen_flags: <defaults>
</compile_context>

<pallas_src>
import jax
import jax.numpy as jnp
from jax.experimental import pallas as pl
from jax.experimental.pallas import tpu as pltpu

H = 32       # h_dim
OUT = 32     # out_channels
L = 4        # num_layers
CIN = 3      # xyz only (use_pc_color=False)
LANES = 128


def _pointnet_kernel(x_ref, w_in_ref, b_in_ref, w_l_ref, b_l_ref,
                     w_gl_ref, w_gg_ref, b_g_ref, w_out_ref, b_out_ref,
                     out_ref, feat_ref):
    relu = lambda v: jnp.maximum(v, 0.0)     # LeakyReLU(negative_slope=0.0) == ReLU
    f32, bf16 = jnp.float32, jnp.bfloat16

    x = x_ref[0]                             # (CIN, N) f32, lane-dense in points

    # conv_in: (H, CIN) @ (CIN, N).  K=3 is a single tiny MXU pass; keep f32.
    y = relu(jnp.dot(w_in_ref[...], x, preferred_element_type=f32)
             + b_in_ref[...])                # (H, N) f32
    y_bf = y.astype(bf16)

    for i in range(L):                       # statically unrolled (L=4)
        # layers[i]
        t = relu(jnp.dot(w_l_ref[i], y_bf, preferred_element_type=f32)
                 + b_l_ref[i])               # (H, N) f32
        t_g = jnp.max(t, axis=1, keepdims=True)          # (H, 1) global max (lanes)
        # global_layers[i] on concat([t, t_g.expand]): local half acts on t via a
        # full (H, N) matmul; the global half is an (H, H) @ (H, 1) mat-vec whose
        # result is folded with the bias into one (H, 1) broadcast add.
        g = (jnp.dot(w_gg_ref[i], t_g.astype(bf16), preferred_element_type=f32)
             + b_g_ref[i])                   # (H, 1) f32, constant per cloud
        y = relu(jnp.dot(w_gl_ref[i], t.astype(bf16), preferred_element_type=f32)
                 + g)                        # (H, N) f32
        y_bf = y.astype(bf16)
        feat_ref[i * H:(i + 1) * H, :] = y_bf            # stage i -> rows [iH,(i+1)H)

    # conv_out fused into one K=128 bf16 matmul over all four stage features.
    o = jnp.dot(w_out_ref[...], feat_ref[...],
                preferred_element_type=f32)              # (OUT, N) f32
    # per-channel bias commutes with the max over points -> add after the reduce.
    out_ref[0] = jnp.max(o, axis=1, keepdims=True) + b_out_ref[...]   # (OUT, 1)


def _full_spec(a):
    nd = a.ndim
    return pl.BlockSpec(a.shape, lambda b, _nd=nd: (0,) * _nd)


@jax.jit
def multistage_pointnet(x, params):
    """x: (B, N, CIN) float32 point cloud -> (B, OUT) float32 global feature."""
    B, N, _ = x.shape
    w_in, b_in, w_l, b_l, w_g, b_g, w_out, b_out = params
    bf16 = jnp.bfloat16

    # channels-major (lane-dense in the point dimension)
    xc = jnp.transpose(x.astype(jnp.float32), (0, 2, 1))          # (B, CIN, N)
    # pad the point dim to a multiple of 128 by repeating the last point; the
    # network's global maxes are invariant to duplicated points.
    n_pad = (-N) % LANES
    if n_pad:
        xc = jnp.concatenate(
            [xc, jnp.broadcast_to(xc[:, :, -1:], (B, CIN, n_pad))], axis=2)
    np_ = N + n_pad

    args = (
        xc,
        w_in.astype(jnp.float32),                      # (H, CIN)
        b_in.reshape(H, 1).astype(jnp.float32),
        w_l.astype(bf16),                              # (L, H, H)
        b_l.reshape(L, H, 1).astype(jnp.float32),
        w_g[:, :, :H].astype(bf16),                    # (L, H, H) local half
        w_g[:, :, H:].astype(bf16),                    # (L, H, H) global half
        b_g.reshape(L, H, 1).astype(jnp.float32),
        w_out.astype(bf16),                            # (OUT, L*H)
        b_out.reshape(OUT, 1).astype(jnp.float32),
    )

    in_specs = [pl.BlockSpec((1, CIN, np_), lambda b: (b, 0, 0))]
    in_specs += [_full_spec(a) for a in args[1:]]

    # explicit VMEM budget: double-buffered input block + f32/bf16 activations +
    # fused (128, N) feature scratch; capped so it also fits v7x's 64 MiB VMEM.
    vmem_bytes = int(min(64 * 2**20, max(16 * 2**20, 2048 * np_ + 4 * 2**20)))

    out = pl.pallas_call(
        _pointnet_kernel,
        out_shape=jax.ShapeDtypeStruct((B, OUT, 1), jnp.float32),
        grid=(B,),
        in_specs=in_specs,
        out_specs=pl.BlockSpec((1, OUT, 1), lambda b: (b, 0, 0)),
        scratch_shapes=[pltpu.VMEM((L * H, np_), bf16)],
        compiler_params=pltpu.CompilerParams(
            dimension_semantics=("parallel",),
            vmem_limit_bytes=vmem_bytes),
    )(*args)
    return out[:, :, 0]


def reference(x, params):
    """Pure-JAX f32 reference mirroring the PyTorch forward exactly."""
    w_in, b_in, w_l, b_l, w_g, b_g, w_out, b_out = params
    relu = lambda v: jnp.maximum(v, 0.0)
    y = relu(jnp.einsum('oc,bnc->bno', w_in, x) + b_in)           # (B, N, H)
    feats = []
    for i in range(L):
        y = relu(jnp.einsum('oh,bnh->bno', w_l[i], y) + b_l[i])
        yg = jnp.max(y, axis=1, keepdims=True)
        y = relu(jnp.einsum('oh,bnh->bno', w_g[i, :, :H], y)
                 + jnp.einsum('oh,bnh->bno', w_g[i, :, H:], yg)
                 + b_g[i])
        feats.append(y)
    f = jnp.concatenate(feats, axis=-1)                           # (B, N, 4H)
    out = jnp.einsum('of,bnf->bno', w_out, f) + b_out             # (B, N, OUT)
    return jnp.max(out, axis=1)                                   # (B, OUT)


def make_params(key):
    ks = jax.random.split(key, 8)
    s = 0.1
    return (
        s * jax.random.normal(ks[0], (H, CIN), jnp.float32),      # conv_in.weight
        s * jax.random.normal(ks[1], (H,), jnp.float32),          # conv_in.bias
        s * jax.random.normal(ks[2], (L, H, H), jnp.float32),     # layers[i].weight
        s * jax.random.normal(ks[3], (L, H), jnp.float32),        # layers[i].bias
        s * jax.random.normal(ks[4], (L, H, 2 * H), jnp.float32), # global_layers[i].weight
        s * jax.random.normal(ks[5], (L, H), jnp.float32),        # global_layers[i].bias
        s * jax.random.normal(ks[6], (OUT, L * H), jnp.float32),  # conv_out.weight
        s * jax.random.normal(ks[7], (OUT,), jnp.float32),        # conv_out.bias
    )


if __name__ == "__main__":
    key = jax.random.PRNGKey(0)
    k_x, k_p = jax.random.split(key)
    B, N = 2, 200                     # N not a multiple of 128 -> exercises padding
    x = jax.random.normal(k_x, (B, N, CIN), jnp.float32)
    params = make_params(k_p)

    got = jax.block_until_ready(multistage_pointnet(x, params))
    want = jax.block_until_ready(reference(x, params))

    assert got.shape == (B, OUT), got.shape
    err = float(jnp.max(jnp.abs(got - want)))
    # kernel uses bf16 MXU inputs with f32 accumulation; reference is pure f32
    assert jnp.allclose(got, want, atol=3e-2, rtol=3e-2), err
    print("KERNEL_OK")
</pallas_src>

<mosaic_0001>
module attributes {stable_mosaic.version = 11 : i64} {
  func.func @_pointnet_kernel(%arg0: i32, %arg1: memref<1x3x256xf32, #tpu.memory_space<vmem>>, %arg2: memref<32x3xf32, #tpu.memory_space<vmem>>, %arg3: memref<32x1xf32, #tpu.memory_space<vmem>>, %arg4: memref<4x32x32xbf16, #tpu.memory_space<vmem>>, %arg5: memref<4x32x1xf32, #tpu.memory_space<vmem>>, %arg6: memref<4x32x32xbf16, #tpu.memory_space<vmem>>, %arg7: memref<4x32x32xbf16, #tpu.memory_space<vmem>>, %arg8: memref<4x32x1xf32, #tpu.memory_space<vmem>>, %arg9: memref<32x128xbf16, #tpu.memory_space<vmem>>, %arg10: memref<32x1xf32, #tpu.memory_space<vmem>>, %arg11: memref<1x32x1xf32, #tpu.memory_space<vmem>>, %arg12: memref<128x256xbf16, #tpu.memory_space<vmem>>) attributes {dimension_semantics = [#tpu.dimension_semantics<parallel>], iteration_bounds = array<i64: 2>, scalar_prefetch = 0 : i64, scratch_operands = 1 : i64, tpu.core_type = #tpu.core_type<tc>, window_params = [{transform_indices = @transform_0, window_bounds = array<i64: 1, 3, 256>}, {pipeline_mode = #tpu.pipeline_mode<synchronous>, transform_indices = @transform_1, window_bounds = array<i64: 32, 3>}, {pipeline_mode = #tpu.pipeline_mode<synchronous>, transform_indices = @transform_2, window_bounds = array<i64: 32, 1>}, {pipeline_mode = #tpu.pipeline_mode<synchronous>, transform_indices = @transform_3, window_bounds = array<i64: 4, 32, 32>}, {pipeline_mode = #tpu.pipeline_mode<synchronous>, transform_indices = @transform_4, window_bounds = array<i64: 4, 32, 1>}, {pipeline_mode = #tpu.pipeline_mode<synchronous>, transform_indices = @transform_5, window_bounds = array<i64: 4, 32, 32>}, {pipeline_mode = #tpu.pipeline_mode<synchronous>, transform_indices = @transform_6, window_bounds = array<i64: 4, 32, 32>}, {pipeline_mode = #tpu.pipeline_mode<synchronous>, transform_indices = @transform_7, window_bounds = array<i64: 4, 32, 1>}, {pipeline_mode = #tpu.pipeline_mode<synchronous>, transform_indices = @transform_8, window_bounds = array<i64: 32, 128>}, {pipeline_mode = #tpu.pipeline_mode<synchronous>, transform_indices = @transform_9, window_bounds = array<i64: 32, 1>}, {transform_indices = @transform_10, window_bounds = array<i64: 1, 32, 1>}]} {
    %c0 = arith.constant 0 : index
    %c0_0 = arith.constant 0 : index
    %c0_1 = arith.constant 0 : index
    %0 = vector.load %arg1[%c0, %c0_0, %c0_1] : memref<1x3x256xf32, #tpu.memory_space<vmem>>, vector<1x3x256xf32>
    %1 = vector.shape_cast %0 : vector<1x3x256xf32> to vector<3x256xf32>
    %c0_2 = arith.constant 0 : index
    %c0_3 = arith.constant 0 : index
    %2 = vector.load %arg2[%c0_2, %c0_3] : memref<32x3xf32, #tpu.memory_space<vmem>>, vector<32x3xf32>
    %cst = arith.constant dense<0.000000e+00> : vector<32x256xf32>
    %3 = tpu.matmul %2, %1, %cst {dimension_numbers = #tpu.dot_dimension_numbers<[1], [0], [0], [1], [0, 0, 1, 1], [], []>} : vector<32x3xf32>, vector<3x256xf32>, vector<32x256xf32> -> vector<32x256xf32>
    %c0_4 = arith.constant 0 : index
    %c0_5 = arith.constant 0 : index
    %4 = vector.load %arg3[%c0_4, %c0_5] : memref<32x1xf32, #tpu.memory_space<vmem>>, vector<32x1xf32>
    %5 = vector.broadcast %4 : vector<32x1xf32> to vector<32x256xf32>
    %6 = arith.addf %3, %5 : vector<32x256xf32>
    %cst_6 = arith.constant 0.000000e+00 : f32
    %7 = vector.broadcast %cst_6 : f32 to vector<32x256xf32>
    %8 = arith.maximumf %6, %7 : vector<32x256xf32>
    %9 = arith.truncf %8 : vector<32x256xf32> to vector<32x256xbf16>
    %c0_7 = arith.constant 0 : index
    %c0_8 = arith.constant 0 : index
    %c0_9 = arith.constant 0 : index
    %10 = vector.load %arg4[%c0_7, %c0_8, %c0_9] : memref<4x32x32xbf16, #tpu.memory_space<vmem>>, vector<1x32x32xbf16>
    %11 = vector.shape_cast %10 : vector<1x32x32xbf16> to vector<32x32xbf16>
    %cst_10 = arith.constant dense<0.000000e+00> : vector<32x256xf32>
    %12 = tpu.matmul %11, %9, %cst_10 {dimension_numbers = #tpu.dot_dimension_numbers<[1], [0], [0], [1], [0, 0, 1, 1], [], []>} : vector<32x32xbf16>, vector<32x256xbf16>, vector<32x256xf32> -> vector<32x256xf32>
    %c0_11 = arith.constant 0 : index
    %c0_12 = arith.constant 0 : index
    %c0_13 = arith.constant 0 : index
    %13 = vector.load %arg5[%c0_11, %c0_12, %c0_13] : memref<4x32x1xf32, #tpu.memory_space<vmem>>, vector<1x32x1xf32>
    %14 = vector.shape_cast %13 : vector<1x32x1xf32> to vector<32x1xf32>
    %15 = vector.broadcast %14 : vector<32x1xf32> to vector<32x256xf32>
    %16 = arith.addf %12, %15 : vector<32x256xf32>
    %cst_14 = arith.constant 0.000000e+00 : f32
    %17 = vector.broadcast %cst_14 : f32 to vector<32x256xf32>
    %18 = arith.maximumf %16, %17 : vector<32x256xf32>
    %cst_15 = arith.constant dense<0xFF800000> : vector<32xf32>
    %19 = vector.multi_reduction <maximumf>, %18, %cst_15 [1] : vector<32x256xf32> to vector<32xf32>
    %20 = vector.shape_cast %19 : vector<32xf32> to vector<32x1xf32>
    %c0_16 = arith.constant 0 : index
    %c0_17 = arith.constant 0 : index
    %c0_18 = arith.constant 0 : index
    %21 = vector.load %arg7[%c0_16, %c0_17, %c0_18] : memref<4x32x32xbf16, #tpu.memory_space<vmem>>, vector<1x32x32xbf16>
    %22 = vector.shape_cast %21 : vector<1x32x32xbf16> to vector<32x32xbf16>
    %23 = arith.truncf %20 : vector<32x1xf32> to vector<32x1xbf16>
    %cst_19 = arith.constant dense<0.000000e+00> : vector<32x1xf32>
    %24 = tpu.matmul %22, %23, %cst_19 {dimension_numbers = #tpu.dot_dimension_numbers<[1], [0], [0], [1], [0, 0, 1, 1], [], []>} : vector<32x32xbf16>, vector<32x1xbf16>, vector<32x1xf32> -> vector<32x1xf32>
    %c0_20 = arith.constant 0 : index
    %c0_21 = arith.constant 0 : index
    %c0_22 = arith.constant 0 : index
    %25 = vector.load %arg8[%c0_20, %c0_21, %c0_22] : memref<4x32x1xf32, #tpu.memory_space<vmem>>, vector<1x32x1xf32>
    %26 = vector.shape_cast %25 : vector<1x32x1xf32> to vector<32x1xf32>
    %27 = arith.addf %24, %26 : vector<32x1xf32>
    %c0_23 = arith.constant 0 : index
    %c0_24 = arith.constant 0 : index
    %c0_25 = arith.constant 0 : index
    %28 = vector.load %arg6[%c0_23, %c0_24, %c0_25] : memref<4x32x32xbf16, #tpu.memory_space<vmem>>, vector<1x32x32xbf16>
    %29 = vector.shape_cast %28 : vector<1x32x32xbf16> to vector<32x32xbf16>
    %30 = arith.truncf %18 : vector<32x256xf32> to vector<32x256xbf16>
    %cst_26 = arith.constant dense<0.000000e+00> : vector<32x256xf32>
    %31 = tpu.matmul %29, %30, %cst_26 {dimension_numbers = #tpu.dot_dimension_numbers<[1], [0], [0], [1], [0, 0, 1, 1], [], []>} : vector<32x32xbf16>, vector<32x256xbf16>, vector<32x256xf32> -> vector<32x256xf32>
    %32 = vector.broadcast %27 : vector<32x1xf32> to vector<32x256xf32>
    %33 = arith.addf %31, %32 : vector<32x256xf32>
    %cst_27 = arith.constant 0.000000e+00 : f32
    %34 = vector.broadcast %cst_27 : f32 to vector<32x256xf32>
    %35 = arith.maximumf %33, %34 : vector<32x256xf32>
    %36 = arith.truncf %35 : vector<32x256xf32> to vector<32x256xbf16>
    %c0_28 = arith.constant 0 : index
    %c0_29 = arith.constant 0 : index
    %37 = vector.load %arg12[%c0_28, %c0_29] : memref<128x256xbf16, #tpu.memory_space<vmem>>, vector<32x256xbf16>
    tpu.vector_store %arg12[%c0_28, %c0_29], %36 {strides = array<i32>} : memref<128x256xbf16, #tpu.memory_space<vmem>>, vector<32x256xbf16>,
    %c1 = arith.constant 1 : index
    %c0_30 = arith.constant 0 : index
    %c0_31 = arith.constant 0 : index
    %38 = vector.load %arg4[%c1, %c0_30, %c0_31] : memref<4x32x32xbf16, #tpu.memory_space<vmem>>, vector<1x32x32xbf16>
    %39 = vector.shape_cast %38 : vector<1x32x32xbf16> to vector<32x32xbf16>
    %cst_32 = arith.constant dense<0.000000e+00> : vector<32x256xf32>
    %40 = tpu.matmul %39, %36, %cst_32 {dimension_numbers = #tpu.dot_dimension_numbers<[1], [0], [0], [1], [0, 0, 1, 1], [], []>} : vector<32x32xbf16>, vector<32x256xbf16>, vector<32x256xf32> -> vector<32x256xf32>
    %c1_33 = arith.constant 1 : index
    %c0_34 = arith.constant 0 : index
    %c0_35 = arith.constant 0 : index
    %41 = vector.load %arg5[%c1_33, %c0_34, %c0_35] : memref<4x32x1xf32, #tpu.memory_space<vmem>>, vector<1x32x1xf32>
    %42 = vector.shape_cast %41 : vector<1x32x1xf32> to vector<32x1xf32>
    %43 = vector.broadcast %42 : vector<32x1xf32> to vector<32x256xf32>
    %44 = arith.addf %40, %43 : vector<32x256xf32>
    %cst_36 = arith.constant 0.000000e+00 : f32
    %45 = vector.broadcast %cst_36 : f32 to vector<32x256xf32>
    %46 = arith.maximumf %44, %45 : vector<32x256xf32>
    %cst_37 = arith.constant dense<0xFF800000> : vector<32xf32>
    %47 = vector.multi_reduction <maximumf>, %46, %cst_37 [1] : vector<32x256xf32> to vector<32xf32>
    %48 = vector.shape_cast %47 : vector<32xf32> to vector<32x1xf32>
    %c1_38 = arith.constant 1 : index
    %c0_39 = arith.constant 0 : index
    %c0_40 = arith.constant 0 : index
    %49 = vector.load %arg7[%c1_38, %c0_39, %c0_40] : memref<4x32x32xbf16, #tpu.memory_space<vmem>>, vector<1x32x32xbf16>
    %50 = vector.shape_cast %49 : vector<1x32x32xbf16> to vector<32x32xbf16>
    %51 = arith.truncf %48 : vector<32x1xf32> to vector<32x1xbf16>
    %cst_41 = arith.constant dense<0.000000e+00> : vector<32x1xf32>
    %52 = tpu.matmul %50, %51, %cst_41 {dimension_numbers = #tpu.dot_dimension_numbers<[1], [0], [0], [1], [0, 0, 1, 1], [], []>} : vector<32x32xbf16>, vector<32x1xbf16>, vector<32x1xf32> -> vector<32x1xf32>
    %c1_42 = arith.constant 1 : index
    %c0_43 = arith.constant 0 : index
    %c0_44 = arith.constant 0 : index
    %53 = vector.load %arg8[%c1_42, %c0_43, %c0_44] : memref<4x32x1xf32, #tpu.memory_space<vmem>>, vector<1x32x1xf32>
    %54 = vector.shape_cast %53 : vector<1x32x1xf32> to vector<32x1xf32>
    %55 = arith.addf %52, %54 : vector<32x1xf32>
    %c1_45 = arith.constant 1 : index
    %c0_46 = arith.constant 0 : index
    %c0_47 = arith.constant 0 : index
    %56 = vector.load %arg6[%c1_45, %c0_46, %c0_47] : memref<4x32x32xbf16, #tpu.memory_space<vmem>>, vector<1x32x32xbf16>
    %57 = vector.shape_cast %56 : vector<1x32x32xbf16> to vector<32x32xbf16>
    %58 = arith.truncf %46 : vector<32x256xf32> to vector<32x256xbf16>
    %cst_48 = arith.constant dense<0.000000e+00> : vector<32x256xf32>
    %59 = tpu.matmul %57, %58, %cst_48 {dimension_numbers = #tpu.dot_dimension_numbers<[1], [0], [0], [1], [0, 0, 1, 1], [], []>} : vector<32x32xbf16>, vector<32x256xbf16>, vector<32x256xf32> -> vector<32x256xf32>
    %60 = vector.broadcast %55 : vector<32x1xf32> to vector<32x256xf32>
    %61 = arith.addf %59, %60 : vector<32x256xf32>
    %cst_49 = arith.constant 0.000000e+00 : f32
    %62 = vector.broadcast %cst_49 : f32 to vector<32x256xf32>
    %63 = arith.maximumf %61, %62 : vector<32x256xf32>
    %64 = arith.truncf %63 : vector<32x256xf32> to vector<32x256xbf16>
    %c32 = arith.constant 32 : index
    %c0_50 = arith.constant 0 : index
    %65 = vector.load %arg12[%c32, %c0_50] : memref<128x256xbf16, #tpu.memory_space<vmem>>, vector<32x256xbf16>
    tpu.vector_store %arg12[%c32, %c0_50], %64 {strides = array<i32>} : memref<128x256xbf16, #tpu.memory_space<vmem>>, vector<32x256xbf16>,
    %c2 = arith.constant 2 : index
    %c0_51 = arith.constant 0 : index
    %c0_52 = arith.constant 0 : index
    %66 = vector.load %arg4[%c2, %c0_51, %c0_52] : memref<4x32x32xbf16, #tpu.memory_space<vmem>>, vector<1x32x32xbf16>
    %67 = vector.shape_cast %66 : vector<1x32x32xbf16> to vector<32x32xbf16>
    %cst_53 = arith.constant dense<0.000000e+00> : vector<32x256xf32>
    %68 = tpu.matmul %67, %64, %cst_53 {dimension_numbers = #tpu.dot_dimension_numbers<[1], [0], [0], [1], [0, 0, 1, 1], [], []>} : vector<32x32xbf16>, vector<32x256xbf16>, vector<32x256xf32> -> vector<32x256xf32>
    %c2_54 = arith.constant 2 : index
    %c0_55 = arith.constant 0 : index
    %c0_56 = arith.constant 0 : index
    %69 = vector.load %arg5[%c2_54, %c0_55, %c0_56] : memref<4x32x1xf32, #tpu.memory_space<vmem>>, vector<1x32x1xf32>
    %70 = vector.shape_cast %69 : vector<1x32x1xf32> to vector<32x1xf32>
    %71 = vector.broadcast %70 : vector<32x1xf32> to vector<32x256xf32>
    %72 = arith.addf %68, %71 : vector<32x256xf32>
    %cst_57 = arith.constant 0.000000e+00 : f32
    %73 = vector.broadcast %cst_57 : f32 to vector<32x256xf32>
    %74 = arith.maximumf %72, %73 : vector<32x256xf32>
    %cst_58 = arith.constant dense<0xFF800000> : vector<32xf32>
    %75 = vector.multi_reduction <maximumf>, %74, %cst_58 [1] : vector<32x256xf32> to vector<32xf32>
    %76 = vector.shape_cast %75 : vector<32xf32> to vector<32x1xf32>
    %c2_59 = arith.constant 2 : index
    %c0_60 = arith.constant 0 : index
    %c0_61 = arith.constant 0 : index
    %77 = vector.load %arg7[%c2_59, %c0_60, %c0_61] : memref<4x32x32xbf16, #tpu.memory_space<vmem>>, vector<1x32x32xbf16>
    %78 = vector.shape_cast %77 : vector<1x32x32xbf16> to vector<32x32xbf16>
    %79 = arith.truncf %76 : vector<32x1xf32> to vector<32x1xbf16>
    %cst_62 = arith.constant dense<0.000000e+00> : vector<32x1xf32>
    %80 = tpu.matmul %78, %79, %cst_62 {dimension_numbers = #tpu.dot_dimension_numbers<[1], [0], [0], [1], [0, 0, 1, 1], [], []>} : vector<32x32xbf16>, vector<32x1xbf16>, vector<32x1xf32> -> vector<32x1xf32>
    %c2_63 = arith.constant 2 : index
    %c0_64 = arith.constant 0 : index
    %c0_65 = arith.constant 0 : index
    %81 = vector.load %arg8[%c2_63, %c0_64, %c0_65] : memref<4x32x1xf32, #tpu.memory_space<vmem>>, vector<1x32x1xf32>
    %82 = vector.shape_cast %81 : vector<1x32x1xf32> to vector<32x1xf32>
    %83 = arith.addf %80, %82 : vector<32x1xf32>
    %c2_66 = arith.constant 2 : index
    %c0_67 = arith.constant 0 : index
    %c0_68 = arith.constant 0 : index
    %84 = vector.load %arg6[%c2_66, %c0_67, %c0_68] : memref<4x32x32xbf16, #tpu.memory_space<vmem>>, vector<1x32x32xbf16>
    %85 = vector.shape_cast %84 : vector<1x32x32xbf16> to vector<32x32xbf16>
    %86 = arith.truncf %74 : vector<32x256xf32> to vector<32x256xbf16>
    %cst_69 = arith.constant dense<0.000000e+00> : vector<32x256xf32>
    %87 = tpu.matmul %85, %86, %cst_69 {dimension_numbers = #tpu.dot_dimension_numbers<[1], [0], [0], [1], [0, 0, 1, 1], [], []>} : vector<32x32xbf16>, vector<32x256xbf16>, vector<32x256xf32> -> vector<32x256xf32>
    %88 = vector.broadcast %83 : vector<32x1xf32> to vector<32x256xf32>
    %89 = arith.addf %87, %88 : vector<32x256xf32>
    %cst_70 = arith.constant 0.000000e+00 : f32
    %90 = vector.broadcast %cst_70 : f32 to vector<32x256xf32>
    %91 = arith.maximumf %89, %90 : vector<32x256xf32>
    %92 = arith.truncf %91 : vector<32x256xf32> to vector<32x256xbf16>
    %c64 = arith.constant 64 : index
    %c0_71 = arith.constant 0 : index
    %93 = vector.load %arg12[%c64, %c0_71] : memref<128x256xbf16, #tpu.memory_space<vmem>>, vector<32x256xbf16>
    tpu.vector_store %arg12[%c64, %c0_71], %92 {strides = array<i32>} : memref<128x256xbf16, #tpu.memory_space<vmem>>, vector<32x256xbf16>,
    %c3 = arith.constant 3 : index
    %c0_72 = arith.constant 0 : index
    %c0_73 = arith.constant 0 : index
    %94 = vector.load %arg4[%c3, %c0_72, %c0_73] : memref<4x32x32xbf16, #tpu.memory_space<vmem>>, vector<1x32x32xbf16>
    %95 = vector.shape_cast %94 : vector<1x32x32xbf16> to vector<32x32xbf16>
    %cst_74 = arith.constant dense<0.000000e+00> : vector<32x256xf32>
    %96 = tpu.matmul %95, %92, %cst_74 {dimension_numbers = #tpu.dot_dimension_numbers<[1], [0], [0], [1], [0, 0, 1, 1], [], []>} : vector<32x32xbf16>, vector<32x256xbf16>, vector<32x256xf32> -> vector<32x256xf32>
    %c3_75 = arith.constant 3 : index
    %c0_76 = arith.constant 0 : index
    %c0_77 = arith.constant 0 : index
    %97 = vector.load %arg5[%c3_75, %c0_76, %c0_77] : memref<4x32x1xf32, #tpu.memory_space<vmem>>, vector<1x32x1xf32>
    %98 = vector.shape_cast %97 : vector<1x32x1xf32> to vector<32x1xf32>
    %99 = vector.broadcast %98 : vector<32x1xf32> to vector<32x256xf32>
    %100 = arith.addf %96, %99 : vector<32x256xf32>
    %cst_78 = arith.constant 0.000000e+00 : f32
    %101 = vector.broadcast %cst_78 : f32 to vector<32x256xf32>
    %102 = arith.maximumf %100, %101 : vector<32x256xf32>
    %cst_79 = arith.constant dense<0xFF800000> : vector<32xf32>
    %103 = vector.multi_reduction <maximumf>, %102, %cst_79 [1] : vector<32x256xf32> to vector<32xf32>
    %104 = vector.shape_cast %103 : vector<32xf32> to vector<32x1xf32>
    %c3_80 = arith.constant 3 : index
    %c0_81 = arith.constant 0 : index
    %c0_82 = arith.constant 0 : index
    %105 = vector.load %arg7[%c3_80, %c0_81, %c0_82] : memref<4x32x32xbf16, #tpu.memory_space<vmem>>, vector<1x32x32xbf16>
    %106 = vector.shape_cast %105 : vector<1x32x32xbf16> to vector<32x32xbf16>
    %107 = arith.truncf %104 : vector<32x1xf32> to vector<32x1xbf16>
    %cst_83 = arith.constant dense<0.000000e+00> : vector<32x1xf32>
    %108 = tpu.matmul %106, %107, %cst_83 {dimension_numbers = #tpu.dot_dimension_numbers<[1], [0], [0], [1], [0, 0, 1, 1], [], []>} : vector<32x32xbf16>, vector<32x1xbf16>, vector<32x1xf32> -> vector<32x1xf32>
    %c3_84 = arith.constant 3 : index
    %c0_85 = arith.constant 0 : index
    %c0_86 = arith.constant 0 : index
    %109 = vector.load %arg8[%c3_84, %c0_85, %c0_86] : memref<4x32x1xf32, #tpu.memory_space<vmem>>, vector<1x32x1xf32>
    %110 = vector.shape_cast %109 : vector<1x32x1xf32> to vector<32x1xf32>
    %111 = arith.addf %108, %110 : vector<32x1xf32>
    %c3_87 = arith.constant 3 : index
    %c0_88 = arith.constant 0 : index
    %c0_89 = arith.constant 0 : index
    %112 = vector.load %arg6[%c3_87, %c0_88, %c0_89] : memref<4x32x32xbf16, #tpu.memory_space<vmem>>, vector<1x32x32xbf16>
    %113 = vector.shape_cast %112 : vector<1x32x32xbf16> to vector<32x32xbf16>
    %114 = arith.truncf %102 : vector<32x256xf32> to vector<32x256xbf16>
    %cst_90 = arith.constant dense<0.000000e+00> : vector<32x256xf32>
    %115 = tpu.matmul %113, %114, %cst_90 {dimension_numbers = #tpu.dot_dimension_numbers<[1], [0], [0], [1], [0, 0, 1, 1], [], []>} : vector<32x32xbf16>, vector<32x256xbf16>, vector<32x256xf32> -> vector<32x256xf32>
    %116 = vector.broadcast %111 : vector<32x1xf32> to vector<32x256xf32>
    %117 = arith.addf %115, %116 : vector<32x256xf32>
    %cst_91 = arith.constant 0.000000e+00 : f32
    %118 = vector.broadcast %cst_91 : f32 to vector<32x256xf32>
    %119 = arith.maximumf %117, %118 : vector<32x256xf32>
    %120 = arith.truncf %119 : vector<32x256xf32> to vector<32x256xbf16>
    %c96 = arith.constant 96 : index
    %c0_92 = arith.constant 0 : index
    %121 = vector.load %arg12[%c96, %c0_92] : memref<128x256xbf16, #tpu.memory_space<vmem>>, vector<32x256xbf16>
    tpu.vector_store %arg12[%c96, %c0_92], %120 {strides = array<i32>} : memref<128x256xbf16, #tpu.memory_space<vmem>>, vector<32x256xbf16>,
    %c0_93 = arith.constant 0 : index
    %c0_94 = arith.constant 0 : index
    %122 = vector.load %arg9[%c0_93, %c0_94] : memref<32x128xbf16, #tpu.memory_space<vmem>>, vector<32x128xbf16>
    %c0_95 = arith.constant 0 : index
    %c0_96 = arith.constant 0 : index
    %123 = vector.load %arg12[%c0_95, %c0_96] : memref<128x256xbf16, #tpu.memory_space<vmem>>, vector<128x256xbf16>
    %cst_97 = arith.constant dense<0.000000e+00> : vector<32x256xf32>
    %124 = tpu.matmul %122, %123, %cst_97 {dimension_numbers = #tpu.dot_dimension_numbers<[1], [0], [0], [1], [0, 0, 1, 1], [], []>} : vector<32x128xbf16>, vector<128x256xbf16>, vector<32x256xf32> -> vector<32x256xf32>
    %cst_98 = arith.constant dense<0xFF800000> : vector<32xf32>
    %125 = vector.multi_reduction <maximumf>, %124, %cst_98 [1] : vector<32x256xf32> to vector<32xf32>
    %126 = vector.shape_cast %125 : vector<32xf32> to vector<32x1xf32>
    %c0_99 = arith.constant 0 : index
    %c0_100 = arith.constant 0 : index
    %127 = vector.load %arg10[%c0_99, %c0_100] : memref<32x1xf32, #tpu.memory_space<vmem>>, vector<32x1xf32>
    %128 = arith.addf %126, %127 : vector<32x1xf32>
    %c0_101 = arith.constant 0 : index
    %c0_102 = arith.constant 0 : index
    %c0_103 = arith.constant 0 : index
    %129 = vector.load %arg11[%c0_101, %c0_102, %c0_103] : memref<1x32x1xf32, #tpu.memory_space<vmem>>, vector<1x32x1xf32>
    %130 = vector.shape_cast %129 : vector<1x32x1xf32> to vector<32x1xf32>
    %131 = vector.shape_cast %128 : vector<32x1xf32> to vector<1x32x1xf32>
    tpu.vector_store %arg11[%c0_101, %c0_102, %c0_103], %131 {strides = array<i32>} : memref<1x32x1xf32, #tpu.memory_space<vmem>>, vector<1x32x1xf32>,
    return
  }
  func.func @transform_0(%arg0: i32) -> (i32, i32, i32) {
    %c0_i32 = arith.constant 0 : i32
    %c0_i32_0 = arith.constant 0 : i32
    %c0_i32_1 = arith.constant 0 : i32
    return %arg0, %c0_i32, %c0_i32_0 : i32, i32, i32
  }
  func.func @transform_1(%arg0: i32) -> (i32, i32) {
    %c0_i32 = arith.constant 0 : i32
    %c0_i32_0 = arith.constant 0 : i32
    %c0_i32_1 = arith.constant 0 : i32
    return %c0_i32, %c0_i32_0 : i32, i32
  }
  func.func @transform_2(%arg0: i32) -> (i32, i32) {
    %c0_i32 = arith.constant 0 : i32
    %c0_i32_0 = arith.constant 0 : i32
    %c0_i32_1 = arith.constant 0 : i32
    return %c0_i32, %c0_i32_0 : i32, i32
  }
  func.func @transform_3(%arg0: i32) -> (i32, i32, i32) {
    %c0_i32 = arith.constant 0 : i32
    %c0_i32_0 = arith.constant 0 : i32
    %c0_i32_1 = arith.constant 0 : i32
    %c0_i32_2 = arith.constant 0 : i32
    return %c0_i32, %c0_i32_0, %c0_i32_1 : i32, i32, i32
  }
  func.func @transform_4(%arg0: i32) -> (i32, i32, i32) {
    %c0_i32 = arith.constant 0 : i32
    %c0_i32_0 = arith.constant 0 : i32
    %c0_i32_1 = arith.constant 0 : i32
    %c0_i32_2 = arith.constant 0 : i32
    return %c0_i32, %c0_i32_0, %c0_i32_1 : i32, i32, i32
  }
  func.func @transform_5(%arg0: i32) -> (i32, i32, i32) {
    %c0_i32 = arith.constant 0 : i32
    %c0_i32_0 = arith.constant 0 : i32
    %c0_i32_1 = arith.constant 0 : i32
    %c0_i32_2 = arith.constant 0 : i32
    return %c0_i32, %c0_i32_0, %c0_i32_1 : i32, i32, i32
  }
  func.func @transform_6(%arg0: i32) -> (i32, i32, i32) {
    %c0_i32 = arith.constant 0 : i32
    %c0_i32_0 = arith.constant 0 : i32
    %c0_i32_1 = arith.constant 0 : i32
    %c0_i32_2 = arith.constant 0 : i32
    return %c0_i32, %c0_i32_0, %c0_i32_1 : i32, i32, i32
  }
  func.func @transform_7(%arg0: i32) -> (i32, i32, i32) {
    %c0_i32 = arith.constant 0 : i32
    %c0_i32_0 = arith.constant 0 : i32
    %c0_i32_1 = arith.constant 0 : i32
    %c0_i32_2 = arith.constant 0 : i32
    return %c0_i32, %c0_i32_0, %c0_i32_1 : i32, i32, i32
  }
  func.func @transform_8(%arg0: i32) -> (i32, i32) {
    %c0_i32 = arith.constant 0 : i32
    %c0_i32_0 = arith.constant 0 : i32
    %c0_i32_1 = arith.constant 0 : i32
    return %c0_i32, %c0_i32_0 : i32, i32
  }
  func.func @transform_9(%arg0: i32) -> (i32, i32) {
    %c0_i32 = arith.constant 0 : i32
    %c0_i32_0 = arith.constant 0 : i32
    %c0_i32_1 = arith.constant 0 : i32
    return %c0_i32, %c0_i32_0 : i32, i32
  }
  func.func @transform_10(%arg0: i32) -> (i32, i32, i32) {
    %c0_i32 = arith.constant 0 : i32
    %c0_i32_0 = arith.constant 0 : i32
    %c0_i32_1 = arith.constant 0 : i32
    return %arg0, %c0_i32, %c0_i32_0 : i32, i32, i32
  }
}

</mosaic_0001>

<bundles_post_ra>
// kernel: multistage_pointnet.1
= control target key start
LH: loop header
LB: loop body
LE: loop exit
PB: predicated region body
PF: predicated region fallthrough
CT: control target
= control target key end

     0   :  { %s2193_s13 = smov 0   ;;  %s2502_s0 = inlined_call_operand.vmem [shape: f32[2,3,256], index: 0, kind: input, shape index: {}]   ;;  %s2503_s1 = inlined_call_operand.vmem [shape: f32[32,3], index: 1, kind: input, shape index: {}]   ;;  %s2504_s2 = inlined_call_operand.vmem [shape: f32[32,1], index: 2, kind: input, shape index: {}]   ;;  %s2505_s3 = inlined_call_operand.vmem [shape: bf16[4,32,32], index: 3, kind: input, shape index: {}]   ;;  %s2506_s4 = inlined_call_operand.vmem [shape: f32[4,32,1], index: 4, kind: input, shape index: {}]   ;;  %s2507_s5 = inlined_call_operand.vmem [shape: bf16[4,32,32], index: 5, kind: input, shape index: {}]   ;;  %s2508_s6 = inlined_call_operand.vmem [shape: bf16[4,32,32], index: 6, kind: input, shape index: {}]   ;;  %s2509_s7 = inlined_call_operand.vmem [shape: f32[4,32,1], index: 7, kind: input, shape index: {}]   ;;  %s2510_s8 = inlined_call_operand.vmem [shape: bf16[32,128], index: 8, kind: input, shape index: {}]   ;;  %s2511_s9 = inlined_call_operand.vmem [shape: f32[32,1], index: 9, kind: input, shape index: {}]   ;;  %s2512_s10 = inlined_call_operand.vmem [shape: f32[2,32,1], index: 10, kind: output, shape index: {}]  }
   0x1 LB: > { %s1912_s14 = sadd.s32 4294967295, %s2134_s13   ;;  %p1916_p0 = scmp.ge.s32.totalorder %s2134_s13, 1  ;;  %s2134_s13 = sphi %s2193_s13, %s20_s13  }
   0x2   : > { %p312_p1 = scmp.lt.s32.totalorder %s2134_s13, 3 }
   0x4   : > { %p313_p2 = pnand %p1916_p0, %p312_p1 }
   0x5   : > { %p350_p3 = scmp.lt.s32.totalorder (!%p313_p2), %s1912_s14, 1  ;;  %v2136_v0 = vmov (!%p313_p2), 0.0   ;;  %v366_v1 = vld [vmem:[%s2504_s2] sm:$0xff] (!%p313_p2)  ;;  %v2137_v2 = vmov (!%p313_p2), 0   ;;  %v368_v3 = vld [vmem:[%s2504_s2 + $0x10] sm:$0xff] (!%p313_p2)  ;;  %vm405_vm0 = vcmask (!%p313_p2), 1042432  }
   0x6   : > { %316 = sbr.rel (%p313_p2) target bundleno = 3588 (0xe04), region = 60  ;;  %474 = vmatprep.mubr.f32.mxu0 (!%p313_p2), %v2136_v0  ;;  %2099 = vset.pattern.permute.xlu0 (!%p313_p2), %v2137_v2  ;;  %vm392_vm1 = vcmask (!%p313_p2), 23552   ;;  %v367_v4 = vld [vmem:[%s2504_s2 + $0x8] sm:$0xff] (!%p313_p2)  ;;  %v369_v5 = vld [vmem:[%s2504_s2 + $0x18] sm:$0xff] (!%p313_p2)  ;;  %v362_v7 = vld [vmem:[%s2503_s1] sm:$0xff] (!%p313_p2)  ;;  %vm549_vm2 = vcmask (!%p313_p2), 261120  }
   0x7   : > { %2100 = vset.pattern.permute.xlu1 (!%p313_p2), %v2137_v2  ;;  %372 = vperm.xlu0 (!%p313_p2), %2099, %v366_v1   ;;  %v515_v8 = vld [vmem:[%s2506_s4] sm:$0xff] (!%p313_p2)  ;;  %v516_v10 = vld [vmem:[%s2506_s4 + $0x8] sm:$0xff] (!%p313_p2)  ;;  %v517_v12 = vld [vmem:[%s2506_s4 + $0x10] sm:$0xff] (!%p313_p2)  ;;  %vm1852_vm3 = vcmask (!%p313_p2), 7168  }
   0x8   : > { %382 = vperm.xlu1 (!%p313_p2), %2100, %v368_v3   ;;  %588 = vmatprep.mubr.bf16.mxu1 (!%p313_p2), %v2137_v2  ;;  %v363_v11 = vld [vmem:[%s2503_s1 + $0x8] sm:$0xff] (!%p313_p2)  ;;  %v518_v13 = vld [vmem:[%s2506_s4 + $0x18] sm:$0xff] (!%p313_p2)  ;;  %v364_v14 = vld [vmem:[%s2503_s1 + $0x10] sm:$0xff] (!%p313_p2) }
   0x9   : > { %v365_v15 = vld [vmem:[%s2503_s1 + $0x18] sm:$0xff] (!%p313_p2)  ;;  %v2102_v48 = vld [vmem:[%s2505_s3] sm:$0xff] (!%p313_p2)   ;;  %v2103_v49 = vld [vmem:[%s2505_s3 + $0x8] sm:$0xff] (!%p313_p2)  }
   0xb   : > { %377 = vperm.xlu0 (!%p313_p2), %2099, %v367_v4  }
   0xc   : > { %387 = vperm.xlu1 (!%p313_p2), %2100, %v369_v5  }
   0xd   : > { %s2514_s14 = smov (!%p350_p3, %s1912_s14), 1 }
   0xe   : > { %s2039_s19 = sshll.u32 %s2514_s14, 3  ;;  %s2040_s25 = sshll.u32 %s2514_s14, 5 }
   0xf   : > { %s354_s26 = scalar_lea.vmem %s2502_s0, %s2039_s19  ;;  %521 = vperm.xlu0 %2099, %v515_v8   ;;  %s359_s30 = scalar_lea.vmem %s2512_s10, %s2040_s25 }
  0x10   : > { %v361_v6 = vld [vmem:[%s354_s26] sm:$0x77]  ;;  %526 = vperm.xlu1 %2100, %v516_v10  }
  0x11   : > { %v391_v9 = vcombine.high %v361_v6, %v361_v6 }
  0x13   : > { %1921 = vmatprep.subr.msk.mxu0 %vm405_vm0, %v391_v9  ;;  %531 = vperm.xlu0 %2099, %v517_v12  }
  0x14   : > { %1922 = vmatpush1.msk.msra.mxu0 %vm405_vm0, %v361_v6  ;;  %536 = vperm.xlu1 %2100, %v518_v13  }
  0x15   : > { %1923 = vmatmul.mubr.msk.f32.vlgmr.msra.gmra.mrb[0].mxu0 %vm392_vm1, %v362_v7 }
  0x16   : > { %480 = vmatprep.mubr.f32.mxu0 %v2136_v0 }
  0x19   : > { %1924 = vmatmul.mubr.msk.f32.gmra.mrb[2].mxu0 %vm392_vm1, %v363_v11 }
  0x1a   : > { %486 = vmatprep.mubr.f32.mxu0 %v2136_v0 }
  0x1d   : > { %1925 = vmatmul.mubr.msk.f32.gmra.mrb[4].mxu0 %vm392_vm1, %v364_v14 }
  0x1e   : > { %492 = vmatprep.mubr.f32.mxu0 %v2136_v0 }
  0x21   : > { %1926 = vmatmul.mubr.msk.f32.gmra.mrb[6].mxu0 %vm392_vm1, %v365_v15 }
  0x86   : > { %v373_v16 = vpop.permute.xlu0 %372 }
  0x87   : > { %v383_v25 = vpop.permute.xlu1 %382 }
  0x8a   : > { %v378_v20 = vpop.permute.xlu0 %377 }
  0x8b   : > { %v388_v36 = vpop.permute.xlu1 %387 }
  0x8e   : > { %v522_v50 = vpop.permute.xlu0 %521 }
  0x8f   : > { %v527_v54 = vpop.permute.xlu1 %526 }
  0x92   : > { %v532_v3 = vpop.permute.xlu0 %531 }
  0x93   : > { %v537_v9 = vpop.permute.xlu1 %536 }
  0xe8   : > { %v476_v17 = vpop.f32.mrb[0].mxu0 }
  0xe9   : > { %v478_v18 = vpop.f32.mrb[1].mxu0  ;;  %v477_v19 = vadd.f32 %v476_v17, %v373_v16 }
  0xea   : > { %v479_v21 = vadd.f32 %v478_v18, %v373_v16 }
  0xeb   : > { %v499_v27 = vmax.f32 %v477_v19, 0.0 }
  0xec   : > { %v482_v22 = vpop.f32.mrb[2].mxu0  ;;  %v500_v29 = vmax.f32 %v479_v21, 0.0 }
  0xed   : > { %v483_v23 = vadd.f32 %v482_v22, %v378_v20  ;;  %v484_v24 = vpop.f32.mrb[3].mxu0 }
  0xee   : > { %v485_v26 = vadd.f32 %v484_v24, %v378_v20  ;;  %v2106_v24 = vld [vmem:[%s2507_s5] sm:$0xff]  }
  0xef   : > { %v501_v28 = vmax.f32 %v483_v23, 0.0  ;;  %v2104_v23 = vld [vmem:[%s2508_s6] sm:$0xff]  }
  0xf0   : > { %v502_v30 = vmax.f32 %v485_v26, 0.0  ;;  %v488_v31 = vpop.f32.mrb[4].mxu0  ;;  %2061 = vmatprep.mubr.msk.bf16.mxu0 %vm549_vm2, %v2104_v23 }
  0xf1   : > { %v490_v32 = vpop.f32.mrb[5].mxu0  ;;  %v507_v33 = vpack.c.bf16 %v501_v28, %v499_v27  ;;  %v489_v35 = vadd.f32 %v488_v31, %v383_v25 }
  0xf2   : > { %v508_v34 = vpack.c.bf16 %v502_v30, %v500_v29  ;;  %v491_v37 = vadd.f32 %v490_v32, %v383_v25  ;;  %v2107_v25 = vld [vmem:[%s2507_s5 + $0x8] sm:$0xff]  }
  0xf3   : > { %v503_v42 = vmax.f32 %v489_v35, 0.0  ;;  %v2105_v32 = vld [vmem:[%s2508_s6 + $0x8] sm:$0xff]  }
  0xf4   : > { %v494_v38 = vpop.f32.mrb[6].mxu0  ;;  %556 = vmatprep.subr.bf16.mxu1 %v508_v34  ;;  %v504_v44 = vmax.f32 %v491_v37, 0.0  ;;  %v635_v37 = vld [vmem:[%s2509_s7] sm:$0xff] }
  0xf5   : > { %v495_v39 = vadd.f32 %v494_v38, %v388_v36  ;;  %v496_v40 = vpop.f32.mrb[7].mxu0  ;;  %557 = vmatpush1.bf16.msra.mxu1 %v507_v33 }
  0xf6   : > { %v497_v41 = vadd.f32 %v496_v40, %v388_v36  ;;  %v636_v40 = vld [vmem:[%s2509_s7 + $0x8] sm:$0xff] }
  0xf7   : > { %v505_v43 = vmax.f32 %v495_v39, 0.0 }
  0xf8   : > { %v506_v45 = vmax.f32 %v497_v41, 0.0 }
  0xf9   : > { %v509_v46 = vpack.c.bf16 %v505_v43, %v503_v42  ;;  %v637_v43 = vld [vmem:[%s2509_s7 + $0x10] sm:$0xff] }
  0xfa   : > { %v510_v47 = vpack.c.bf16 %v506_v45, %v504_v44 }
  0xfc   : > { %558 = vmatprep.subr.bf16.mxu1 %v510_v47 }
  0xfd   : > { %559 = vmatpush1.bf16.msra.mxu1 %v509_v46 }
 0x100   : > { %1929 = vmatmul.mubr.msk.bf16.vlgmr.msra.gmra.mrb[0].mxu1 %vm549_vm2, %v2102_v48 }
 0x101   : > { %598 = vmatprep.mubr.bf16.mxu1 %v2137_v2 }
 0x108   : > { %1930 = vmatmul.mubr.msk.bf16.gmra.mrb[4].mxu1 %vm549_vm2, %v2103_v49  ;;  %v638_v49 = vld [vmem:[%s2509_s7 + $0x18] sm:$0xff] }
 0x109   : > { %780 = vmatprep.mubr.bf16.mxu1 %v2137_v2 }
 0x1d3   : > { %v590_v51 = vpop.f32.mrb[0].mxu1 }
 0x1d4   : > { %v591_v52 = vadd.f32 %v590_v51, %v522_v50  ;;  %v592_v53 = vpop.f32.mrb[1].mxu1 }
 0x1d5   : > { %v593_v55 = vadd.f32 %v592_v53, %v522_v50  ;;  %v594_v56 = vpop.f32.mrb[2].mxu1  ;;  %v1943_v50 = vld [vmem:[%s2506_s4 + $0x20] sm:$0xff] }
 0x1d6   : > { %v609_v57 = vmax.f32 %v591_v52, 0.0  ;;  %v595_v58 = vadd.f32 %v594_v56, %v527_v54  ;;  %v596_v59 = vpop.f32.mrb[3].mxu1  ;;  %v1946_v56 = vld [vmem:[%s2506_s4 + $0x38] sm:$0xff] }
 0x1d7   : > { %v610_v60 = vmax.f32 %v593_v55, 0.0  ;;  %v597_v61 = vadd.f32 %v596_v59, %v527_v54  ;;  %v1945_v54 = vld [vmem:[%s2506_s4 + $0x30] sm:$0xff]  ;;  %v1944_v55 = vld [vmem:[%s2506_s4 + $0x28] sm:$0xff] }
 0x1d8   : > { %v611_v62 = vmax.f32 %v595_v58, 0.0 }
 0x1d9   : > { %v612_v63 = vmax.f32 %v597_v61, 0.0  ;;  %v617_v0 = vmax.f32 %v609_v57, %v610_v60 }
 0x1da   : > { %v708_v1 = vpack.c.bf16 %v611_v62, %v609_v57 }
 0x1db   : > { %v709_v4 = vpack.c.bf16 %v612_v63, %v610_v60  ;;  %v600_v5 = vpop.f32.mrb[4].mxu1  ;;  %618 = vmax.xlane.f32.xlu0 %v617_v0  ;;  %v620_v6 = vmax.f32 %v611_v62, %v612_v63 }
 0x1dc   : > { %v601_v7 = vadd.f32 %v600_v5, %v532_v3  ;;  %v602_v8 = vpop.f32.mrb[5].mxu1 }
 0x1dd   : > { %v603_v10 = vadd.f32 %v602_v8, %v532_v3  ;;  %v604_v11 = vpop.f32.mrb[6].mxu1  ;;  %621 = vmax.xlane.f32.xlu1 %v620_v6  ;;  %748 = vmatprep.subr.bf16.mxu1 %v709_v4 }
 0x1de   : > { %v613_v12 = vmax.f32 %v601_v7, 0.0  ;;  %v605_v13 = vadd.f32 %v604_v11, %v537_v9  ;;  %v606_v14 = vpop.f32.mrb[7].mxu1  ;;  %749 = vmatpush1.bf16.msra.mxu1 %v708_v1 }
 0x1df   : > { %v614_v15 = vmax.f32 %v603_v10, 0.0  ;;  %v607_v16 = vadd.f32 %v606_v14, %v537_v9 }
 0x1e0   : > { %v615_v17 = vmax.f32 %v605_v13, 0.0 }
 0x1e1   : > { %v616_v18 = vmax.f32 %v607_v16, 0.0  ;;  %v623_v19 = vmax.f32 %v613_v12, %v614_v15 }
 0x1e2   : > { %v710_v20 = vpack.c.bf16 %v615_v17, %v613_v12 }
 0x1e3   : > { %v711_v21 = vpack.c.bf16 %v616_v18, %v614_v15  ;;  %624 = vmax.xlane.f32.xlu0 %v623_v19  ;;  %v626_v22 = vmax.f32 %v615_v17, %v616_v18  ;;  %v2108_v18 = vld [vmem:[%s2505_s3 + $0x10] sm:$0xff]   ;;  %v2109_v19 = vld [vmem:[%s2505_s3 + $0x18] sm:$0xff]  }
 0x1e5   : > { %750 = vmatprep.subr.bf16.mxu1 %v711_v21 }
 0x1e6   : > { %751 = vmatpush1.bf16.msra.mxu1 %v710_v20 }
 0x1e7   : > { %627 = vmax.xlane.f32.xlu0 %v626_v22 }
 0x1e9   : > { %1937 = vmatmul.mubr.msk.bf16.vlgmr.msra.gmra.mrb[8].mxu1 %vm549_vm2, %v2106_v24 }
 0x1ea   : > { %790 = vmatprep.mubr.bf16.mxu1 %v2137_v2 }
 0x1f1   : > { %1938 = vmatmul.mubr.msk.bf16.gmra.mrb[12].mxu1 %vm549_vm2, %v2107_v25 }
 0x268   : > { %v619_v26 = vpop.xlane.xlu0 %618 }
 0x26a   : > { %v622_v27 = vpop.xlane.xlu1 %621 }
 0x26b   : > { %v633_v28 = vpack.c.bf16 %v622_v27, %v619_v26 }
 0x26d   : > { %2057 = vmatprep.subr.bf16.mxu0 %v633_v28 }
 0x26e   : > { %2058 = vmatpush3.bf16.msra.mxu0 %v633_v28 }
 0x270   : > { %v625_v29 = vpop.xlane.xlu0 %624 }
 0x274   : > { %v628_v30 = vpop.xlane.xlu0 %627 }
 0x275   : > { %v634_v31 = vpack.c.bf16 %v628_v30, %v625_v29 }
 0x277   : > { %2059 = vmatprep.subr.bf16.mxu0 %v634_v31 }
 0x278   : > { %2060 = vmatpush3.bf16.msra.mxu0 %v634_v31 }
 0x27b   : > { %2062 = vmatmul.mubr.msk.bf16.vlgmr.msra.gmra.mrb[8].mxu0 %vm549_vm2, %v2105_v32 }
 0x27c   : > { %895 = vmatprep.mubr.bf16.mxu0 %v2137_v2 }
 0x2bc   : > { %v782_v33 = vpop.f32.mrb[8].mxu1 }
 0x2bd   : > { %v784_v34 = vpop.f32.mrb[9].mxu1 }
 0x2be   : > { %v786_v35 = vpop.f32.mrb[10].mxu1 }
 0x2bf   : > { %v788_v36 = vpop.f32.mrb[11].mxu1 }
 0x2c4   : > { %v792_v46 = vpop.f32.mrb[12].mxu1 }
 0x2c5   : > { %v794_v48 = vpop.f32.mrb[13].mxu1 }
 0x2c6   : > { %v796_v51 = vpop.f32.mrb[14].mxu1 }
 0x2c7   : > { %v798_v52 = vpop.f32.mrb[15].mxu1 }
 0x34e   : > { %v2063_v38 = vpop.f32.mrb[8].mxu0 }
 0x34f   : > { %v689_v39 = vpop.f32.mrb[9].mxu0  ;;  %v698_v47 = vadd.f32 %v2063_v38, %v637_v43 }
 0x350   : > { %v690_v41 = vadd.f32 %v689_v39, %v635_v37  ;;  %v2064_v42 = vpop.f32.mrb[10].mxu0 }
 0x351   : > { %v692_v44 = vpop.f32.mrb[11].mxu0  ;;  %v701_v53 = vadd.f32 %v2064_v42, %v638_v49 }
 0x352   : > { %v693_v45 = vadd.f32 %v692_v44, %v636_v40  ;;  %714 = vperm.xlu1 %2100, %v690_v41  }
 0x354   : > { %719 = vperm.xlu0 %2099, %v693_v45  }
 0x356   : > { %724 = vperm.xlu1 %2100, %v698_v47  }
 0x358   : > { %829 = vperm.xlu0 %2099, %v1943_v50  }
 0x35a   : > { %729 = vperm.xlu1 %2100, %v701_v53  }
 0x35c   : > { %839 = vperm.xlu0 %2099, %v1945_v54  }
 0x35e   : > { %834 = vperm.xlu1 %2100, %v1944_v55  }
 0x362   : > { %844 = vperm.xlu1 %2100, %v1946_v56   ;;  %v2110_v56 = vld [vmem:[%s2508_s6 + $0x10] sm:$0xff]  }
 0x363   : > { %2069 = vmatprep.mubr.msk.bf16.mxu1 %vm549_vm2, %v2110_v56  ;;  %v2115_v56 = vld [vmem:[%s2505_s3 + $0x28] sm:$0xff]  }
 0x3d1   : > { %v715_v57 = vpop.permute.xlu1 %714 }
 0x3d2   : > { %v783_v58 = vadd.f32 %v782_v33, %v715_v57  ;;  %v785_v59 = vadd.f32 %v784_v34, %v715_v57  ;;  %v2112_v57 = vld [vmem:[%s2507_s5 + $0x10] sm:$0xff]  }
 0x3d3   : > { %v720_v60 = vpop.permute.xlu0 %719 }
 0x3d4   : > { %v787_v61 = vadd.f32 %v786_v35, %v720_v60  ;;  %v789_v62 = vadd.f32 %v788_v36, %v720_v60  ;;  %v801_v0 = vmax.f32 %v783_v58, 0.0  ;;  %v802_v1 = vmax.f32 %v785_v59, 0.0  ;;  %v2113_v58 = vld [vmem:[%s2507_s5 + $0x18] sm:$0xff]  }
 0x3d5   : > { %v725_v63 = vpop.permute.xlu1 %724 }
 0x3d6   : > { %v803_v3 = vmax.f32 %v787_v61, 0.0  ;;  %v804_v4 = vmax.f32 %v789_v62, 0.0  ;;  %v793_v6 = vadd.f32 %v792_v46, %v725_v63  ;;  %v795_v7 = vadd.f32 %v794_v48, %v725_v63 }
 0x3d7   : > { %v830_v20 = vpop.permute.xlu0 %829 }
 0x3d8   : > { %v2304_v5 = vpack.c.bf16 %v803_v3, %v801_v0  ;;  %v2306_v8 = vpack.c.bf16 %v804_v4, %v802_v1  ;;  %v805_v12 = vmax.f32 %v793_v6, 0.0  ;;  %v806_v13 = vmax.f32 %v795_v7, 0.0  ;;  %v2111_v1 = vld [vmem:[%s2508_s6 + $0x18] sm:$0xff]  }
 0x3d9   : > { %v730_v9 = vpop.permute.xlu1 %729 }
 0x3da   : > { %v797_v10 = vadd.f32 %v796_v51, %v730_v9  ;;  %v799_v11 = vadd.f32 %v798_v52, %v730_v9  ;;  %863 = vmatprep.subr.bf16.mxu0 %v2306_v8  ;;  %v1955_v9 = vld [vmem:[%s2509_s7 + $0x20] sm:$0xff] }
 0x3db   : > { %864 = vmatpush1.bf16.msra.mxu0 %v2304_v5  ;;  %v840_v36 = vpop.permute.xlu0 %839 }
 0x3dc   : > { %v807_v14 = vmax.f32 %v797_v10, 0.0  ;;  %v808_v15 = vmax.f32 %v799_v11, 0.0 }
 0x3dd   : > { %v835_v24 = vpop.permute.xlu1 %834 }
 0x3de   : > { %v2310_v16 = vpack.c.bf16 %v807_v14, %v805_v12  ;;  %v2312_v17 = vpack.c.bf16 %v808_v15, %v806_v13  ;;  %v1956_v12 = vld [vmem:[%s2509_s7 + $0x28] sm:$0xff]  ;;  %v1957_v15 = vld [vmem:[%s2509_s7 + $0x30] sm:$0xff] }
 0x3e0   : > { %865 = vmatprep.subr.bf16.mxu0 %v2312_v17 }
 0x3e1   : > { %866 = vmatpush1.bf16.msra.mxu0 %v2310_v16  ;;  %v845_v42 = vpop.permute.xlu1 %844 }
 0x3e4   : > { %1949 = vmatmul.mubr.msk.bf16.vlgmr.msra.gmra.mrb[12].mxu0 %vm549_vm2, %v2108_v18 }
 0x3e5   : > { %905 = vmatprep.mubr.bf16.mxu0 %v2137_v2 }
 0x3ec   : > { %1950 = vmatmul.mubr.msk.bf16.gmra.mrb[16].mxu0 %vm549_vm2, %v2109_v19 }
 0x3ed   : > { %1090 = vmatprep.mubr.bf16.mxu0 %v2137_v2 }
 0x4b7   : > { %v897_v21 = vpop.f32.mrb[12].mxu0 }
 0x4b8   : > { %v898_v22 = vadd.f32 %v897_v21, %v830_v20  ;;  %v899_v23 = vpop.f32.mrb[13].mxu0 }
 0x4b9   : > { %v900_v25 = vadd.f32 %v899_v23, %v830_v20  ;;  %v901_v26 = vpop.f32.mrb[14].mxu0  ;;  %v1958_v23 = vld [vmem:[%s2509_s7 + $0x38] sm:$0xff] }
 0x4ba   : > { %v916_v27 = vmax.f32 %v898_v22, 0.0  ;;  %v902_v28 = vadd.f32 %v901_v26, %v835_v24  ;;  %v903_v29 = vpop.f32.mrb[15].mxu0 }
 0x4bb   : > { %v917_v30 = vmax.f32 %v900_v25, 0.0  ;;  %v904_v31 = vadd.f32 %v903_v29, %v835_v24  ;;  %v1975_v24 = vld [vmem:[%s2506_s4 + $0x40] sm:$0xff]  ;;  %v1976_v29 = vld [vmem:[%s2506_s4 + $0x48] sm:$0xff] }
 0x4bc   : > { %v918_v32 = vmax.f32 %v902_v28, 0.0  ;;  %v1977_v28 = vld [vmem:[%s2506_s4 + $0x50] sm:$0xff] }
 0x4bd   : > { %v919_v33 = vmax.f32 %v904_v31, 0.0  ;;  %v924_v34 = vmax.f32 %v916_v27, %v917_v30 }
 0x4be   : > { %v1018_v35 = vpack.c.bf16 %v918_v32, %v916_v27 }
 0x4bf   : > { %v1019_v37 = vpack.c.bf16 %v919_v33, %v917_v30  ;;  %v907_v38 = vpop.f32.mrb[16].mxu0  ;;  %925 = vmax.xlane.f32.xlu0 %v924_v34  ;;  %v927_v39 = vmax.f32 %v918_v32, %v919_v33  ;;  %v1978_v30 = vld [vmem:[%s2506_s4 + $0x58] sm:$0xff] }
 0x4c0   : > { %v908_v40 = vadd.f32 %v907_v38, %v840_v36  ;;  %v909_v41 = vpop.f32.mrb[17].mxu0 }
 0x4c1   : > { %v910_v43 = vadd.f32 %v909_v41, %v840_v36  ;;  %v911_v44 = vpop.f32.mrb[18].mxu0  ;;  %1058 = vmatprep.subr.bf16.mxu0 %v1019_v37  ;;  %928 = vmax.xlane.f32.xlu1 %v927_v39 }
 0x4c2   : > { %v920_v45 = vmax.f32 %v908_v40, 0.0  ;;  %v912_v46 = vadd.f32 %v911_v44, %v845_v42  ;;  %v913_v47 = vpop.f32.mrb[19].mxu0  ;;  %1059 = vmatpush1.bf16.msra.mxu0 %v1018_v35 }
 0x4c3   : > { %v921_v48 = vmax.f32 %v910_v43, 0.0  ;;  %v914_v49 = vadd.f32 %v913_v47, %v845_v42 }
 0x4c4   : > { %v922_v50 = vmax.f32 %v912_v46, 0.0 }
 0x4c5   : > { %v923_v51 = vmax.f32 %v914_v49, 0.0  ;;  %v930_v52 = vmax.f32 %v920_v45, %v921_v48 }
 0x4c6   : > { %v1020_v53 = vpack.c.bf16 %v922_v50, %v920_v45 }
 0x4c7   : > { %v1021_v54 = vpack.c.bf16 %v923_v51, %v921_v48  ;;  %931 = vmax.xlane.f32.xlu0 %v930_v52  ;;  %v933_v55 = vmax.f32 %v922_v50, %v923_v51 }
 0x4c9   : > { %1060 = vmatprep.subr.bf16.mxu0 %v1021_v54 }
 0x4ca   : > { %1061 = vmatpush1.bf16.msra.mxu0 %v1020_v53 }
 0x4cb   : > { %934 = vmax.xlane.f32.xlu0 %v933_v55  ;;  %v2114_v55 = vld [vmem:[%s2505_s3 + $0x20] sm:$0xff]  }
 0x4cd   : > { %1969 = vmatmul.mubr.msk.bf16.vlgmr.msra.gmra.mrb[20].mxu0 %vm549_vm2, %v2112_v57 }
 0x4ce   : > { %1100 = vmatprep.mubr.bf16.mxu0 %v2137_v2 }
 0x4d5   : > { %1970 = vmatmul.mubr.msk.bf16.gmra.mrb[24].mxu0 %vm549_vm2, %v2113_v58 }
 0x54c   : > { %v926_v59 = vpop.xlane.xlu0 %925 }
 0x54e   : > { %v929_v60 = vpop.xlane.xlu1 %928 }
 0x54f   : > { %v941_v61 = vpack.c.bf16 %v929_v60, %v926_v59 }
 0x551   : > { %2065 = vmatprep.subr.bf16.mxu1 %v941_v61 }
 0x552   : > { %2066 = vmatpush3.bf16.msra.mxu1 %v941_v61 }
 0x554   : > { %v932_v62 = vpop.xlane.xlu0 %931 }
 0x558   : > { %v935_v63 = vpop.xlane.xlu0 %934 }
 0x559   : > { %v942_v0 = vpack.c.bf16 %v935_v63, %v932_v62 }
 0x55b   : > { %2067 = vmatprep.subr.bf16.mxu1 %v942_v0 }
 0x55c   : > { %2068 = vmatpush3.bf16.msra.mxu1 %v942_v0 }
 0x55f   : > { %2070 = vmatmul.mubr.msk.bf16.vlgmr.msra.gmra.mrb[16].mxu1 %vm549_vm2, %v2111_v1 }
 0x560   : > { %1205 = vmatprep.mubr.bf16.mxu1 %v2137_v2 }
 0x5a0   : > { %v1092_v3 = vpop.f32.mrb[20].mxu0 }
 0x5a1   : > { %v1094_v4 = vpop.f32.mrb[21].mxu0 }
 0x5a2   : > { %v1096_v6 = vpop.f32.mrb[22].mxu0 }
 0x5a3   : > { %v1098_v7 = vpop.f32.mrb[23].mxu0 }
 0x5a8   : > { %v1102_v20 = vpop.f32.mrb[24].mxu0 }
 0x5a9   : > { %v1104_v22 = vpop.f32.mrb[25].mxu0 }
 0x5aa   : > { %v1106_v25 = vpop.f32.mrb[26].mxu0 }
 0x5ab   : > { %v1108_v26 = vpop.f32.mrb[27].mxu0 }
 0x632   : > { %v2071_v10 = vpop.f32.mrb[16].mxu1 }
 0x633   : > { %v998_v11 = vpop.f32.mrb[17].mxu1  ;;  %v1007_v21 = vadd.f32 %v2071_v10, %v1957_v15 }
 0x634   : > { %v999_v13 = vadd.f32 %v1955_v9, %v998_v11  ;;  %v2072_v14 = vpop.f32.mrb[18].mxu1 }
 0x635   : > { %v1001_v18 = vpop.f32.mrb[19].mxu1  ;;  %v1010_v27 = vadd.f32 %v2072_v14, %v1958_v23 }
 0x636   : > { %v1002_v19 = vadd.f32 %v1956_v12, %v1001_v18  ;;  %1024 = vperm.xlu1 %2100, %v999_v13  }
 0x638   : > { %1029 = vperm.xlu0 %2099, %v1002_v19  }
 0x63a   : > { %1034 = vperm.xlu1 %2100, %v1007_v21  }
 0x63c   : > { %1139 = vperm.xlu0 %2099, %v1975_v24  }
 0x63e   : > { %1039 = vperm.xlu1 %2100, %v1010_v27  }
 0x640   : > { %1149 = vperm.xlu0 %2099, %v1977_v28  }
 0x642   : > { %1144 = vperm.xlu1 %2100, %v1976_v29  }
 0x646   : > { %1154 = vperm.xlu1 %2100, %v1978_v30  }
 0x6b5   : > { %v1025_v31 = vpop.permute.xlu1 %1024 }
 0x6b6   : > { %v1093_v32 = vadd.f32 %v1092_v3, %v1025_v31  ;;  %v1095_v33 = vadd.f32 %v1094_v4, %v1025_v31 }
 0x6b7   : > { %v1030_v34 = vpop.permute.xlu0 %1029 }
 0x6b8   : > { %v1097_v35 = vadd.f32 %v1096_v6, %v1030_v34  ;;  %v1099_v36 = vadd.f32 %v1098_v7, %v1030_v34  ;;  %v1111_v38 = vmax.f32 %v1093_v32, 0.0  ;;  %v1112_v39 = vmax.f32 %v1095_v33, 0.0  ;;  %v2116_v34 = vld [vmem:[%s2507_s5 + $0x20] sm:$0xff]  }
 0x6b9   : > { %v1035_v37 = vpop.permute.xlu1 %1034 }
 0x6ba   : > { %v1113_v40 = vmax.f32 %v1097_v35, 0.0  ;;  %v1114_v41 = vmax.f32 %v1099_v36, 0.0  ;;  %v1103_v43 = vadd.f32 %v1102_v20, %v1035_v37  ;;  %v1105_v44 = vadd.f32 %v1104_v22, %v1035_v37 }
 0x6bb   : > { %v1140_v57 = vpop.permute.xlu0 %1139 }
 0x6bc   : > { %v2368_v42 = vpack.c.bf16 %v1113_v40, %v1111_v38  ;;  %v2370_v45 = vpack.c.bf16 %v1114_v41, %v1112_v39  ;;  %v1115_v49 = vmax.f32 %v1103_v43, 0.0  ;;  %v1116_v50 = vmax.f32 %v1105_v44, 0.0  ;;  %v2118_v39 = vld [vmem:[%s2508_s6 + $0x28] sm:$0xff]   ;;  %v1987_v44 = vld [vmem:[%s2509_s7 + $0x40] sm:$0xff] }
 0x6bd   : > { %v1040_v46 = vpop.permute.xlu1 %1039 }
 0x6be   : > { %v1107_v47 = vadd.f32 %v1106_v25, %v1040_v46  ;;  %v1109_v48 = vadd.f32 %v1108_v26, %v1040_v46  ;;  %1173 = vmatprep.subr.bf16.mxu1 %v2370_v45 }
 0x6bf   : > { %1174 = vmatpush1.bf16.msra.mxu1 %v2368_v42  ;;  %v1150_v12 = vpop.permute.xlu0 %1149 }
 0x6c0   : > { %v1117_v51 = vmax.f32 %v1107_v47, 0.0  ;;  %v1118_v52 = vmax.f32 %v1109_v48, 0.0  ;;  %v1988_v47 = vld [vmem:[%s2509_s7 + $0x48] sm:$0xff] }
 0x6c1   : > { %v1145_v61 = vpop.permute.xlu1 %1144 }
 0x6c2   : > { %v2374_v53 = vpack.c.bf16 %v1117_v51, %v1115_v49  ;;  %v1122_v54 = vpack.c.bf16 %v1118_v52, %v1116_v50  ;;  %v1989_v50 = vld [vmem:[%s2509_s7 + $0x50] sm:$0xff] }
 0x6c4   : > { %1175 = vmatprep.subr.bf16.mxu1 %v1122_v54 }
 0x6c5   : > { %1176 = vmatpush1.bf16.msra.mxu1 %v2374_v53  ;;  %v1155_v20 = vpop.permute.xlu1 %1154 }
 0x6c8   : > { %1981 = vmatmul.mubr.msk.bf16.vlgmr.msra.gmra.mrb[20].mxu1 %vm549_vm2, %v2114_v55 }
 0x6c9   : > { %1215 = vmatprep.mubr.bf16.mxu1 %v2137_v2 }
 0x6d0   : > { %1982 = vmatmul.mubr.msk.bf16.gmra.mrb[24].mxu1 %vm549_vm2, %v2115_v56  ;;  %v1990_v56 = vld [vmem:[%s2509_s7 + $0x58] sm:$0xff] }
 0x6d1   : > { %1400 = vmatprep.mubr.bf16.mxu1 %v2137_v2 }
 0x79b   : > { %v1207_v58 = vpop.f32.mrb[20].mxu1 }
 0x79c   : > { %v1208_v59 = vadd.f32 %v1207_v58, %v1140_v57  ;;  %v1209_v60 = vpop.f32.mrb[21].mxu1 }
 0x79d   : > { %v1210_v62 = vadd.f32 %v1209_v60, %v1140_v57  ;;  %v1211_v63 = vpop.f32.mrb[22].mxu1  ;;  %v2007_v57 = vld [vmem:[%s2506_s4 + $0x60] sm:$0xff] }
 0x79e   : > { %v1226_v0 = vmax.f32 %v1208_v59, 0.0  ;;  %v1212_v1 = vadd.f32 %v1211_v63, %v1145_v61  ;;  %v1213_v3 = vpop.f32.mrb[23].mxu1  ;;  %v2010_v63 = vld [vmem:[%s2506_s4 + $0x78] sm:$0xff] }
 0x79f   : > { %v1227_v4 = vmax.f32 %v1210_v62, 0.0  ;;  %v1214_v6 = vadd.f32 %v1213_v3, %v1145_v61  ;;  %v2009_v61 = vld [vmem:[%s2506_s4 + $0x70] sm:$0xff]  ;;  %v2008_v62 = vld [vmem:[%s2506_s4 + $0x68] sm:$0xff] }
 0x7a0   : > { %v1228_v7 = vmax.f32 %v1212_v1, 0.0 }
 0x7a1   : > { %v1229_v9 = vmax.f32 %v1214_v6, 0.0  ;;  %v1234_v10 = vmax.f32 %v1226_v0, %v1227_v4 }
 0x7a2   : > { %v1328_v11 = vpack.c.bf16 %v1228_v7, %v1226_v0 }
 0x7a3   : > { %v1329_v13 = vpack.c.bf16 %v1229_v9, %v1227_v4  ;;  %v1217_v14 = vpop.f32.mrb[24].mxu1  ;;  %1235 = vmax.xlane.f32.xlu0 %v1234_v10  ;;  %v1237_v15 = vmax.f32 %v1228_v7, %v1229_v9 }
 0x7a4   : > { %v1218_v18 = vadd.f32 %v1217_v14, %v1150_v12  ;;  %v1219_v19 = vpop.f32.mrb[25].mxu1 }
 0x7a5   : > { %v1220_v21 = vadd.f32 %v1219_v19, %v1150_v12  ;;  %v1221_v22 = vpop.f32.mrb[26].mxu1  ;;  %1368 = vmatprep.subr.bf16.mxu1 %v1329_v13  ;;  %1238 = vmax.xlane.f32.xlu1 %v1237_v15 }
 0x7a6   : > { %v1230_v23 = vmax.f32 %v1218_v18, 0.0  ;;  %v1222_v24 = vadd.f32 %v1221_v22, %v1155_v20  ;;  %v1223_v25 = vpop.f32.mrb[27].mxu1  ;;  %1369 = vmatpush1.bf16.msra.mxu1 %v1328_v11 }
 0x7a7   : > { %v1231_v26 = vmax.f32 %v1220_v21, 0.0  ;;  %v1224_v27 = vadd.f32 %v1223_v25, %v1155_v20 }
 0x7a8   : > { %v1232_v28 = vmax.f32 %v1222_v24, 0.0 }
 0x7a9   : > { %v1233_v29 = vmax.f32 %v1224_v27, 0.0  ;;  %v1240_v30 = vmax.f32 %v1230_v23, %v1231_v26 }
 0x7aa   : > { %v1330_v31 = vpack.c.bf16 %v1232_v28, %v1230_v23 }
 0x7ab   : > { %v1331_v32 = vpack.c.bf16 %v1233_v29, %v1231_v26  ;;  %1241 = vmax.xlane.f32.xlu0 %v1240_v30  ;;  %v1243_v33 = vmax.f32 %v1232_v28, %v1233_v29  ;;  %v2120_v29 = vld [vmem:[%s2505_s3 + $0x30] sm:$0xff]   ;;  %v2121_v30 = vld [vmem:[%s2505_s3 + $0x38] sm:$0xff]  }
 0x7ad   : > { %1370 = vmatprep.subr.bf16.mxu1 %v1331_v32 }
 0x7ae   : > { %1371 = vmatpush1.bf16.msra.mxu1 %v1330_v31 }
 0x7af   : > { %1779 = vmatprep.subr.bf16.mxu1 %v2306_v8  ;;  %1244 = vmax.xlane.f32.xlu0 %v1243_v33  ;;  %v2117_v8 = vld [vmem:[%s2508_s6 + $0x20] sm:$0xff]  }
 0x7b0   : > { %2077 = vmatprep.mubr.msk.bf16.mxu0 %vm549_vm2, %v2117_v8 }
 0x7b1   : > { %2001 = vmatmul.mubr.msk.bf16.vlgmr.msra.gmra.mrb[28].mxu1 %vm549_vm2, %v2116_v34 }
 0x7b2   : > { %1780 = vmatpush1.bf16.msra.mxu1 %v2304_v5  ;;  %1410 = vmatprep.mubr.bf16.mxu1 %v2137_v2  ;;  %v2119_v5 = vld [vmem:[%s2507_s5 + $0x28] sm:$0xff]  }
 0x7b3   : > { %1781 = vmatprep.subr.bf16.mxu1 %v2312_v17 }
 0x7b6   : > { %1782 = vmatpush1.bf16.msra.mxu1 %v2310_v16 }
 0x7b7   : > { %1783 = vmatprep.subr.bf16.mxu1 %v2370_v45 }
 0x7b9   : > { %2002 = vmatmul.mubr.msk.bf16.gmra.mrb[32].mxu1 %vm549_vm2, %v2119_v5 }
 0x7ba   : > { %1784 = vmatpush1.bf16.msra.mxu1 %v2368_v42  ;;  %1811 = vmatprep.mubr.bf16.mxu1 %v2137_v2 }
 0x7bb   : > { %1785 = vmatprep.subr.bf16.mxu1 %v1122_v54 }
 0x7be   : > { %1786 = vmatpush1.bf16.msra.mxu1 %v2374_v53 }
 0x830   : > { %v1236_v16 = vpop.xlane.xlu0 %1235 }
 0x832   : > { %v1239_v17 = vpop.xlane.xlu1 %1238 }
 0x833   : > { %v1251_v35 = vpack.c.bf16 %v1239_v17, %v1236_v16 }
 0x835   : > { %2073 = vmatprep.subr.bf16.mxu0 %v1251_v35 }
 0x836   : > { %2074 = vmatpush3.bf16.msra.mxu0 %v1251_v35 }
 0x838   : > { %v1242_v36 = vpop.xlane.xlu0 %1241 }
 0x83c   : > { %v1245_v37 = vpop.xlane.xlu0 %1244 }
 0x83d   : > { %v1252_v38 = vpack.c.bf16 %v1245_v37, %v1242_v36 }
 0x83f   : > { %2075 = vmatprep.subr.bf16.mxu0 %v1252_v38 }
 0x840   : > { %2076 = vmatpush3.bf16.msra.mxu0 %v1252_v38 }
 0x843   : > { %2078 = vmatmul.mubr.msk.bf16.vlgmr.msra.gmra.mrb[28].mxu0 %vm549_vm2, %v2118_v39 }
 0x844   : > { %1515 = vmatprep.mubr.bf16.mxu0 %v2137_v2 }
 0x884   : > { %v1402_v40 = vpop.f32.mrb[28].mxu1 }
 0x885   : > { %v1404_v41 = vpop.f32.mrb[29].mxu1 }
 0x886   : > { %v1406_v42 = vpop.f32.mrb[30].mxu1 }
 0x887   : > { %v1408_v43 = vpop.f32.mrb[31].mxu1 }
 0x88c   : > { %v1412_v53 = vpop.f32.mrb[32].mxu1 }
 0x88d   : > { %v1414_v55 = vpop.f32.mrb[33].mxu1 }
 0x88e   : > { %v1416_v58 = vpop.f32.mrb[34].mxu1 }
 0x88f   : > { %v1418_v59 = vpop.f32.mrb[35].mxu1 }
 0x916   : > { %v2079_v45 = vpop.f32.mrb[28].mxu0 }
 0x917   : > { %v1308_v46 = vpop.f32.mrb[29].mxu0  ;;  %v1317_v54 = vadd.f32 %v2079_v45, %v1989_v50 }
 0x918   : > { %v1309_v48 = vadd.f32 %v1987_v44, %v1308_v46  ;;  %v2080_v49 = vpop.f32.mrb[30].mxu0 }
 0x919   : > { %v1311_v51 = vpop.f32.mrb[31].mxu0  ;;  %v1320_v60 = vadd.f32 %v2080_v49, %v1990_v56 }
 0x91a   : > { %v1312_v52 = vadd.f32 %v1988_v47, %v1311_v51  ;;  %1334 = vperm.xlu1 %2100, %v1309_v48  }
 0x91c   : > { %1339 = vperm.xlu0 %2099, %v1312_v52  }
 0x91e   : > { %1344 = vperm.xlu1 %2100, %v1317_v54  }
 0x920   : > { %1449 = vperm.xlu0 %2099, %v2007_v57  }
 0x922   : > { %1349 = vperm.xlu1 %2100, %v1320_v60  }
 0x924   : > { %1459 = vperm.xlu0 %2099, %v2009_v61  }
 0x926   : > { %1454 = vperm.xlu1 %2100, %v2008_v62  }
 0x92a   : > { %1464 = vperm.xlu1 %2100, %v2010_v63   ;;  %v2122_v63 = vld [vmem:[%s2508_s6 + $0x30] sm:$0xff]  }
 0x999   : > { %v1335_v0 = vpop.permute.xlu1 %1334 }
 0x99a   : > { %v1403_v1 = vadd.f32 %v1402_v40, %v1335_v0  ;;  %v1405_v3 = vadd.f32 %v1404_v41, %v1335_v0 }
 0x99b   : > { %v1340_v4 = vpop.permute.xlu0 %1339 }
 0x99c   : > { %v1407_v6 = vadd.f32 %v1406_v42, %v1340_v4  ;;  %v1409_v7 = vadd.f32 %v1408_v43, %v1340_v4  ;;  %v1421_v10 = vmax.f32 %v1403_v1, 0.0  ;;  %v1422_v11 = vmax.f32 %v1405_v3, 0.0 }
 0x99d   : > { %v1345_v9 = vpop.permute.xlu1 %1344 }
 0x99e   : > { %v1423_v12 = vmax.f32 %v1407_v6, 0.0  ;;  %v1424_v13 = vmax.f32 %v1409_v7, 0.0  ;;  %v1413_v15 = vadd.f32 %v1412_v53, %v1345_v9  ;;  %v1415_v18 = vadd.f32 %v1414_v55, %v1345_v9  ;;  %v2123_v9 = vld [vmem:[%s2508_s6 + $0x38] sm:$0xff]  }
 0x99f   : > { %v1450_v31 = vpop.permute.xlu0 %1449 }
 0x9a0   : > { %v1429_v14 = vpack.c.bf16 %v1423_v12, %v1421_v10  ;;  %v1430_v19 = vpack.c.bf16 %v1424_v13, %v1422_v11  ;;  %v1425_v23 = vmax.f32 %v1413_v15, 0.0  ;;  %v1426_v24 = vmax.f32 %v1415_v18, 0.0  ;;  %v2124_v10 = vld [vmem:[%s2507_s5 + $0x30] sm:$0xff]   ;;  %v2125_v11 = vld [vmem:[%s2507_s5 + $0x38] sm:$0xff]   ;;  %v2019_v12 = vld [vmem:[%s2509_s7 + $0x60] sm:$0xff] }
 0x9a1   : > { %v1350_v20 = vpop.permute.xlu1 %1349  ;;  %v2020_v15 = vld [vmem:[%s2509_s7 + $0x68] sm:$0xff] }
 0x9a2   : > { %v1417_v21 = vadd.f32 %v1416_v58, %v1350_v20  ;;  %v1419_v22 = vadd.f32 %v1418_v59, %v1350_v20  ;;  %1483 = vmatprep.subr.bf16.mxu0 %v1430_v19  ;;  %1787 = vmatprep.subr.bf16.mxu1 %v1430_v19  ;;  %v2021_v20 = vld [vmem:[%s2509_s7 + $0x70] sm:$0xff] }
 0x9a3   : > { %1484 = vmatpush1.bf16.msra.mxu0 %v1429_v14  ;;  %1788 = vmatpush1.bf16.msra.mxu1 %v1429_v14  ;;  %v1460_v43 = vpop.permute.xlu0 %1459 }
 0x9a4   : > { %v1427_v25 = vmax.f32 %v1417_v21, 0.0  ;;  %v1428_v26 = vmax.f32 %v1419_v22, 0.0 }
 0x9a5   : > { %v1455_v8 = vpop.permute.xlu1 %1454 }
 0x9a6   : > { %v1431_v27 = vpack.c.bf16 %v1427_v25, %v1425_v23  ;;  %v1432_v28 = vpack.c.bf16 %v1428_v26, %v1426_v24  ;;  %v2022_v24 = vld [vmem:[%s2509_s7 + $0x78] sm:$0xff] }
 0x9a8   : > { %1485 = vmatprep.subr.bf16.mxu0 %v1432_v28  ;;  %1789 = vmatprep.subr.bf16.mxu1 %v1432_v28 }
 0x9a9   : > { %1486 = vmatpush1.bf16.msra.mxu0 %v1431_v27  ;;  %1790 = vmatpush1.bf16.msra.mxu1 %v1431_v27  ;;  %v1465_v49 = vpop.permute.xlu1 %1464 }
 0x9ac   : > { %2013 = vmatmul.mubr.msk.bf16.vlgmr.msra.gmra.mrb[32].mxu0 %vm549_vm2, %v2120_v29 }
 0x9ad   : > { %1525 = vmatprep.mubr.bf16.mxu0 %v2137_v2 }
 0x9b4   : > { %2014 = vmatmul.mubr.msk.bf16.gmra.mrb[36].mxu0 %vm549_vm2, %v2121_v30 }
 0x9b5   : > { %2085 = vmatprep.mubr.msk.bf16.mxu0 %vm549_vm2, %v2122_v63 }
 0xa7f   : > { %v1517_v32 = vpop.f32.mrb[32].mxu0 }
 0xa80   : > { %v1518_v33 = vadd.f32 %v1517_v32, %v1450_v31  ;;  %v1519_v34 = vpop.f32.mrb[33].mxu0 }
 0xa81   : > { %v1520_v5 = vadd.f32 %v1519_v34, %v1450_v31  ;;  %v1521_v16 = vpop.f32.mrb[34].mxu0 }
 0xa82   : > { %v1536_v17 = vmax.f32 %v1518_v33, 0.0  ;;  %v1522_v35 = vadd.f32 %v1521_v16, %v1455_v8  ;;  %v1523_v36 = vpop.f32.mrb[35].mxu0 }
 0xa83   : > { %v1537_v37 = vmax.f32 %v1520_v5, 0.0  ;;  %v1524_v38 = vadd.f32 %v1523_v36, %v1455_v8 }
 0xa84   : > { %v1538_v39 = vmax.f32 %v1522_v35, 0.0 }
 0xa85   : > { %v1539_v40 = vmax.f32 %v1524_v38, 0.0  ;;  %v1544_v41 = vmax.f32 %v1536_v17, %v1537_v37 }
 0xa86   : > { %v1638_v42 = vpack.c.bf16 %v1538_v39, %v1536_v17 }
 0xa87   : > { %v1639_v44 = vpack.c.bf16 %v1539_v40, %v1537_v37  ;;  %v1527_v45 = vpop.f32.mrb[36].mxu0  ;;  %1545 = vmax.xlane.f32.xlu0 %v1544_v41  ;;  %v1547_v46 = vmax.f32 %v1538_v39, %v1539_v40 }
 0xa88   : > { %v1528_v47 = vadd.f32 %v1527_v45, %v1460_v43  ;;  %v1529_v48 = vpop.f32.mrb[37].mxu0 }
 0xa89   : > { %v1530_v50 = vadd.f32 %v1529_v48, %v1460_v43  ;;  %v1531_v51 = vpop.f32.mrb[38].mxu0  ;;  %1548 = vmax.xlane.f32.xlu1 %v1547_v46 }
 0xa8a   : > { %v1540_v52 = vmax.f32 %v1528_v47, 0.0  ;;  %v1532_v53 = vadd.f32 %v1531_v51, %v1465_v49  ;;  %v1533_v54 = vpop.f32.mrb[39].mxu0 }
 0xa8b   : > { %v1541_v55 = vmax.f32 %v1530_v50, 0.0  ;;  %v1534_v56 = vadd.f32 %v1533_v54, %v1465_v49  ;;  %v2126_v54 = vld [vmem:[%s2510_s8] sm:$0xff]  }
 0xa8c   : > { %v1542_v57 = vmax.f32 %v1532_v53, 0.0 }
 0xa8d   : > { %v1543_v58 = vmax.f32 %v1534_v56, 0.0  ;;  %v1550_v59 = vmax.f32 %v1540_v52, %v1541_v55 }
 0xa8e   : > { %v1640_v60 = vpack.c.bf16 %v1542_v57, %v1540_v52 }
 0xa8f   : > { %v1641_v61 = vpack.c.bf16 %v1543_v58, %v1541_v55  ;;  %1551 = vmax.xlane.f32.xlu0 %v1550_v59  ;;  %v1553_v62 = vmax.f32 %v1542_v57, %v1543_v58  ;;  %v2127_v55 = vld [vmem:[%s2510_s8 + $0x8] sm:$0xff]  }
 0xa93   : > { %1554 = vmax.xlane.f32.xlu0 %v1553_v62 }
 0xb14   : > { %v1546_v0 = vpop.xlane.xlu0 %1545 }
 0xb16   : > { %v1549_v1 = vpop.xlane.xlu1 %1548 }
 0xb17   : > { %v1561_v3 = vpack.c.bf16 %v1549_v1, %v1546_v0 }
 0xb19   : > { %2081 = vmatprep.subr.bf16.mxu0 %v1561_v3 }
 0xb1a   : > { %2082 = vmatpush3.bf16.msra.mxu0 %v1561_v3 }
 0xb1c   : > { %v1552_v4 = vpop.xlane.xlu0 %1551 }
 0xb20   : > { %v1555_v6 = vpop.xlane.xlu0 %1554 }
 0xb21   : > { %v1562_v7 = vpack.c.bf16 %v1555_v6, %v1552_v4  ;;  %v1844_v4 = vld [vmem:[%s2511_s9] sm:$0xff] }
 0xb23   : > { %2083 = vmatprep.subr.bf16.mxu0 %v1562_v7 }
 0xb24   : > { %2084 = vmatpush3.bf16.msra.mxu0 %v1562_v7  ;;  %v1845_v7 = vld [vmem:[%s2511_s9 + $0x8] sm:$0xff] }
 0xb25   : > { %1678 = vmatprep.subr.bf16.mxu0 %v1639_v44 }
 0xb27   : > { %2086 = vmatmul.mubr.msk.bf16.vlgmr.msra.gmra.mrb[40].mxu0 %vm549_vm2, %v2123_v9 }
 0xb28   : > { %1679 = vmatpush1.bf16.msra.mxu0 %v1638_v42  ;;  %1710 = vmatprep.mubr.bf16.mxu0 %v2137_v2 }
 0xb29   : > { %1680 = vmatprep.subr.bf16.mxu0 %v1641_v61 }
 0xb2c   : > { %1681 = vmatpush1.bf16.msra.mxu0 %v1640_v60 }
 0xb2f   : > { %2033 = vmatmul.mubr.msk.bf16.vlgmr.msra.gmra.mrb[44].mxu0 %vm549_vm2, %v2124_v10 }
 0xb30   : > { %1720 = vmatprep.mubr.bf16.mxu0 %v2137_v2 }
 0xb37   : > { %2034 = vmatmul.mubr.msk.bf16.gmra.mrb[48].mxu0 %vm549_vm2, %v2125_v11 }
 0xbfa   : > { %v2087_v13 = vpop.f32.mrb[40].mxu0 }
 0xbfb   : > { %v1618_v14 = vpop.f32.mrb[41].mxu0  ;;  %v1627_v23 = vadd.f32 %v2087_v13, %v2021_v20 }
 0xbfc   : > { %v1619_v18 = vadd.f32 %v2019_v12, %v1618_v14  ;;  %v2088_v19 = vpop.f32.mrb[42].mxu0  ;;  %v1846_v12 = vld [vmem:[%s2511_s9 + $0x10] sm:$0xff] }
 0xbfd   : > { %v1621_v21 = vpop.f32.mrb[43].mxu0  ;;  %v1630_v27 = vadd.f32 %v2088_v19, %v2022_v24 }
 0xbfe   : > { %v1622_v22 = vadd.f32 %v2020_v15, %v1621_v21  ;;  %1644 = vperm.xlu1 %2100, %v1619_v18   ;;  %v1847_v15 = vld [vmem:[%s2511_s9 + $0x18] sm:$0xff] }
 0xc00   : > { %1649 = vperm.xlu0 %2099, %v1622_v22  }
 0xc02   : > { %1654 = vperm.xlu1 %2100, %v1627_v23   ;;  %v1712_v25 = vpop.f32.mrb[44].mxu0 }
 0xc03   : > { %v1714_v26 = vpop.f32.mrb[45].mxu0 }
 0xc04   : > { %v1716_v28 = vpop.f32.mrb[46].mxu0 }
 0xc05   : > { %v1718_v29 = vpop.f32.mrb[47].mxu0 }
 0xc06   : > { %1659 = vperm.xlu1 %2100, %v1630_v27  }
 0xc0a   : > { %v1722_v30 = vpop.f32.mrb[48].mxu0 }
 0xc0b   : > { %v1724_v31 = vpop.f32.mrb[49].mxu0 }
 0xc0c   : > { %v1726_v32 = vpop.f32.mrb[50].mxu0 }
 0xc0d   : > { %v1728_v33 = vpop.f32.mrb[51].mxu0 }
 0xc7d   : > { %v1645_v34 = vpop.permute.xlu1 %1644 }
 0xc7e   : > { %v1713_v8 = vadd.f32 %v1712_v25, %v1645_v34  ;;  %v1715_v5 = vadd.f32 %v1714_v26, %v1645_v34 }
 0xc7f   : > { %v1650_v16 = vpop.permute.xlu0 %1649 }
 0xc80   : > { %v1717_v17 = vadd.f32 %v1716_v28, %v1650_v16  ;;  %v1719_v35 = vadd.f32 %v1718_v29, %v1650_v16  ;;  %v1731_v37 = vmax.f32 %v1713_v8, 0.0  ;;  %v1732_v38 = vmax.f32 %v1715_v5, 0.0 }
 0xc81   : > { %v1655_v36 = vpop.permute.xlu1 %1654 }
 0xc82   : > { %v1733_v39 = vmax.f32 %v1717_v17, 0.0  ;;  %v1734_v40 = vmax.f32 %v1719_v35, 0.0  ;;  %v1723_v42 = vadd.f32 %v1722_v30, %v1655_v36  ;;  %v1725_v43 = vadd.f32 %v1724_v31, %v1655_v36 }
 0xc84   : > { %v1739_v41 = vpack.c.bf16 %v1733_v39, %v1731_v37  ;;  %v1740_v44 = vpack.c.bf16 %v1734_v40, %v1732_v38  ;;  %v1735_v48 = vmax.f32 %v1723_v42, 0.0  ;;  %v1736_v49 = vmax.f32 %v1725_v43, 0.0 }
 0xc85   : > { %v1660_v45 = vpop.permute.xlu1 %1659 }
 0xc86   : > { %v1727_v46 = vadd.f32 %v1726_v32, %v1660_v45  ;;  %v1729_v47 = vadd.f32 %v1728_v33, %v1660_v45  ;;  %1791 = vmatprep.subr.bf16.mxu1 %v1740_v44 }
 0xc87   : > { %1792 = vmatpush1.bf16.msra.mxu1 %v1739_v41 }
 0xc88   : > { %v1737_v50 = vmax.f32 %v1727_v46, 0.0  ;;  %v1738_v51 = vmax.f32 %v1729_v47, 0.0 }
 0xc8a   : > { %v1741_v52 = vpack.c.bf16 %v1737_v50, %v1735_v48  ;;  %v1742_v53 = vpack.c.bf16 %v1738_v51, %v1736_v49 }
 0xc8c   : > { %1793 = vmatprep.subr.bf16.mxu1 %v1742_v53 }
 0xc8d   : > { %1794 = vmatpush1.bf16.msra.mxu1 %v1741_v52 }
 0xc90   : > { %1812 = vmatmul.mubr.bf16.vlgmr.msra.gmra.mrb[36].mxu1 %v2126_v54 }
 0xc91   : > { %1821 = vmatprep.mubr.bf16.mxu1 %v2137_v2 }
 0xc98   : > { %1822 = vmatmul.mubr.bf16.gmra.mrb[40].mxu1 %v2127_v55 }
 0xd63   : > { %v1813_v56 = vpop.f32.mrb[36].mxu1 }
 0xd64   : > { %v1815_v57 = vpop.f32.mrb[37].mxu1 }
 0xd65   : > { %v1832_v58 = vmax.f32 %v1813_v56, %v1815_v57  ;;  %v1817_v59 = vpop.f32.mrb[38].mxu1 }
 0xd66   : > { %v1819_v60 = vpop.f32.mrb[39].mxu1 }
 0xd67   : > { %v1835_v61 = vmax.f32 %v1817_v59, %v1819_v60  ;;  %1833 = vmax.xlane.f32.xlu0 %v1832_v58 }
 0xd69   : > { %1836 = vmax.xlane.f32.xlu1 %v1835_v61 }
 0xd6b   : > { %v1823_v62 = vpop.f32.mrb[40].mxu1 }
 0xd6c   : > { %v1825_v63 = vpop.f32.mrb[41].mxu1 }
 0xd6d   : > { %v1838_v0 = vmax.f32 %v1823_v62, %v1825_v63  ;;  %v1827_v1 = vpop.f32.mrb[42].mxu1 }
 0xd6e   : > { %v1829_v3 = vpop.f32.mrb[43].mxu1 }
 0xd6f   : > { %1839 = vmax.xlane.f32.xlu0 %v1838_v0  ;;  %v1841_v2 = vmax.f32 %v1827_v1, %v1829_v3 }
 0xd73   : > { %1842 = vmax.xlane.f32.xlu0 %v1841_v2 }
 0xdf4   : > { %v1834_v6 = vpop.xlane.xlu0 %1833 }
 0xdf5   : > { %v1848_v9 = vadd.f32 %v1844_v4, %v1834_v6 }
 0xdf6   : > { %v1837_v10 = vpop.xlane.xlu1 %1836 }
 0xdf7   : > { %1853 = vst.msk [vmem:[%s359_s30] sm:$0xff] %vm1852_vm3, %v1848_v9  ;;  %v1849_v11 = vadd.f32 %v1845_v7, %v1837_v10 }
 0xdf9   : > { %1854 = vst.msk [vmem:[%s359_s30 + $0x8] sm:$0xff] %vm1852_vm3, %v1849_v11 }
 0xdfc   : > { %v1840_v13 = vpop.xlane.xlu0 %1839 }
 0xdfd   : > { %v1850_v14 = vadd.f32 %v1846_v12, %v1840_v13 }
 0xdff   : > { %1855 = vst.msk [vmem:[%s359_s30 + $0x10] sm:$0xff] %vm1852_vm3, %v1850_v14 }
 0xe00   : > { %v1843_v18 = vpop.xlane.xlu0 %1842 }
 0xe01   : > { %v1851_v19 = vadd.f32 %v1847_v15, %v1843_v18 }
 0xe03   : > { %1856 = vst.msk [vmem:[%s359_s30 + $0x18] sm:$0xff] %vm1852_vm3, %v1851_v19 }
 0xe04 PF: > { %s20_s13 = sadd.s32 1, %s2134_s13  }
 0xe05   : > { %p17_p4 = scmp.ge.s32.totalorder %s20_s13, 4  }
 0xe07   :  { %19 = sbr.rel (!%p17_p4) target bundleno = 1 (0x1), region = 105 }

</bundles_post_ra>
